<compile_context>
chip_gen: v6e
topology: v6e:2x2x1
jax: 0.10.0
libtpu: 0.0.40
codegen_flags: <defaults>
</compile_context>

<pallas_src>
import jax
import jax.numpy as jnp
from jax import lax
from jax.experimental import pallas as pl
from jax.experimental.pallas import tpu as pltpu


def _round_up(x, m):
    return (x + m - 1) // m * m


def gru_chunk_kernel(len_ref, emb_ref, wi_ref, bi_ref, wh_ref, bhn_ref,
                     hout_ref, h_carry, xp_ref):
    """One (batch_block, time_chunk) grid step of the GRU recurrence.

    len_ref  : (Bb, 1)        int32  valid lengths (padded batch rows = 0)
    emb_ref  : (Tc, Bb, E)    bf16   embedded tokens for this chunk
    wi_ref   : (E, 3H)        bf16   fused input weights [W_ir|W_iz|W_in]
    bi_ref   : (1, 3H)        f32    fused input biases (r/z hidden biases pre-summed)
    wh_ref   : (H, 3H)        bf16   fused hidden weights [W_hr|W_hz|W_hn]
    bhn_ref  : (1, H)         f32    hidden bias of the n gate (stays inside r*(.))
    hout_ref : (Tc, Bb, H)    f32    masked hidden states (zero where t >= length)
    h_carry  : (Bb, H)        f32    VMEM scratch: hidden state carried across chunks
    xp_ref   : (Tc, Bb, 3H)   f32    VMEM scratch: per-chunk input projection
    """
    Tc, Bb, E = emb_ref.shape
    H = hout_ref.shape[2]
    tc = pl.program_id(1)

    @pl.when(tc == 0)
    def _():
        h_carry[...] = jnp.zeros_like(h_carry)

    # ---- fused per-chunk input projection: one (Tc*Bb, E) x (E, 3H) bf16 matmul,
    # off the serial path of the recurrence.
    x = emb_ref[...].reshape(Tc * Bb, E)
    xp_ref[...] = (jnp.dot(x, wi_ref[...], preferred_element_type=jnp.float32)
                   + bi_ref[...]).reshape(Tc, Bb, 3 * H)

    # ---- loop-invariant values hoisted out of the recurrence (no per-step
    # re-broadcast / re-materialized zeros).
    lens = len_ref[...]                                    # (Bb, 1) int32
    wh = wh_ref[...]                                       # (H, 3H) bf16
    bhn_b = jnp.broadcast_to(bhn_ref[...], (Bb, H))
    zeros_bh = jnp.zeros((Bb, H), jnp.float32)
    t_base = tc * Tc

    def step(t, h_prev):
        xp = xp_ref[t]                                     # (Bb, 3H) f32
        # Single-pass bf16 MXU matmul on the serial critical path; f32 accum.
        hp = jnp.dot(h_prev.astype(jnp.bfloat16), wh,
                     preferred_element_type=jnp.float32)   # (Bb, 3H)
        # Whole-vreg lane slices (H is a multiple of 128).
        r = jax.nn.sigmoid(xp[:, 0 * H:1 * H] + hp[:, 0 * H:1 * H])
        z = jax.nn.sigmoid(xp[:, 1 * H:2 * H] + hp[:, 1 * H:2 * H])
        n = jnp.tanh(xp[:, 2 * H:3 * H] + r * (hp[:, 2 * H:3 * H] + bhn_b))
        h_new = n + z * (h_prev - n)                       # == (1-z)*n + z*h_prev

        valid = (t_base + t) < lens                        # (Bb, 1) bool
        # pad_packed_sequence pads outputs with zeros at t >= length.
        hout_ref[t] = jnp.where(valid, h_new, zeros_bh)
        # pack_padded_sequence: hidden state only advances on valid steps.
        return jnp.where(valid, h_new, h_prev)

    # Partial unroll: keeps LLO scheduling visibility without T-sized code bloat.
    h_carry[...] = lax.fori_loop(0, Tc, step, h_carry[...], unroll=min(4, Tc))


def tagger_forward(tokens, lengths, params, *, t_chunk=None, b_block=None):
    """tokens: (T, B) int32, lengths: (B,) int32. Returns (T, B, num_tags)."""
    emb = jnp.take(params["embedding"], tokens, axis=0)          # (T, B, E) f32
    T, B, E = emb.shape
    H = params["whr"].shape[0]
    num_tags = params["wlin"].shape[1]

    f32, bf16 = jnp.float32, jnp.bfloat16

    # Padded, TPU-native shapes.
    B_pad = _round_up(max(B, 16), 16)        # sublane multiple (bf16-safe)
    H_pad = _round_up(max(H, 128), 128)      # lane multiple
    E_pad = _round_up(max(E, 128), 128)
    NT_pad = _round_up(max(num_tags, 128), 128)

    if t_chunk is None:
        t_chunk = max(1, min(T, 32))
    T_pad = _round_up(T, t_chunk)
    n_tc = T_pad // t_chunk

    if b_block is None:
        b_block = B_pad                      # single batch block at small B
    B_pad = _round_up(B_pad, b_block)
    n_bb = B_pad // b_block

    # ---- fused + padded weights (gate g lives at lanes [g*H_pad, g*H_pad+H)) --
    wi = jnp.zeros((E_pad, 3 * H_pad), f32)
    bi = jnp.zeros((1, 3 * H_pad), f32)
    for g, (w, b) in enumerate([(params["wir"], params["br"]),
                                (params["wiz"], params["bz"]),
                                (params["win"], params["bin"])]):
        wi = wi.at[:E, g * H_pad:g * H_pad + H].set(w)
        bi = bi.at[:, g * H_pad:g * H_pad + H].set(b)
    wi = wi.astype(bf16)

    wh = jnp.zeros((H_pad, 3 * H_pad), f32)
    for g, w in enumerate([params["whr"], params["whz"], params["whn"]]):
        wh = wh.at[:H, g * H_pad:g * H_pad + H].set(w)
    wh = wh.astype(bf16)

    bhn = jnp.zeros((1, H_pad), f32).at[:, :H].set(params["bhn"])

    # ---- padded activations / lengths ----------------------------------------
    emb_p = jnp.pad(emb.astype(bf16),
                    ((0, T_pad - T), (0, B_pad - B), (0, E_pad - E)))
    lens = jnp.zeros((B_pad, 1), jnp.int32).at[:B, 0].set(lengths.astype(jnp.int32))

    # ---- VMEM budget: resident weights + double-buffered chunks + scratch ----
    weight_bytes = (E_pad * 3 * H_pad * 2 + H_pad * 3 * H_pad * 2
                    + 3 * H_pad * 4 + H_pad * 4)
    chunk_bytes = (t_chunk * b_block * E_pad * 2          # emb block (bf16)
                   + t_chunk * b_block * H_pad * 4        # hout block (f32)
                   + b_block * 4)                         # lens block
    scratch_bytes = b_block * H_pad * 4 + t_chunk * b_block * 3 * H_pad * 4
    vmem_bytes = 2 * weight_bytes + 2 * 2 * chunk_bytes + scratch_bytes + (4 << 20)
    vmem_bytes = int(min(64 << 20, max(vmem_bytes, 16 << 20)))

    hout = pl.pallas_call(
        gru_chunk_kernel,
        out_shape=jax.ShapeDtypeStruct((T_pad, B_pad, H_pad), f32),
        grid_spec=pltpu.PrefetchScalarGridSpec(
            num_scalar_prefetch=0,
            grid=(n_bb, n_tc),
            in_specs=[
                pl.BlockSpec((b_block, 1), lambda bb, tc: (bb, 0)),                 # lens
                pl.BlockSpec((t_chunk, b_block, E_pad), lambda bb, tc: (tc, bb, 0)),  # emb
                pl.BlockSpec((E_pad, 3 * H_pad), lambda bb, tc: (0, 0)),            # wi
                pl.BlockSpec((1, 3 * H_pad), lambda bb, tc: (0, 0)),                # bi
                pl.BlockSpec((H_pad, 3 * H_pad), lambda bb, tc: (0, 0)),            # wh
                pl.BlockSpec((1, H_pad), lambda bb, tc: (0, 0)),                    # bhn
            ],
            out_specs=pl.BlockSpec((t_chunk, b_block, H_pad),
                                   lambda bb, tc: (tc, bb, 0)),
            scratch_shapes=[
                pltpu.VMEM((b_block, H_pad), f32),                  # hidden-state carry
                pltpu.VMEM((t_chunk, b_block, 3 * H_pad), f32),     # chunk input proj
            ],
        ),
        compiler_params=pltpu.CompilerParams(
            dimension_semantics=("parallel", "arbitrary"),
            vmem_limit_bytes=vmem_bytes,
        ),
    )(lens, emb_p, wi, bi, wh, bhn)

    # ---- output Linear on the padded, lane-dense hidden slab ------------------
    # Padded H lanes / padded B rows / padded T steps of hout are provably zero,
    # so padding wlin keeps the result unchanged; only leading dims + the tag
    # lane dim are sliced at the very end.
    wlin = jnp.zeros((H_pad, NT_pad), f32).at[:H, :num_tags].set(params["wlin"])
    blin = jnp.zeros((1, NT_pad), f32).at[:, :num_tags].set(params["blin"])
    out = jnp.einsum("tbh,ho->tbo", hout, wlin) + blin
    return out[:T, :B, :num_tags]


def tagger_reference(tokens, lengths, params):
    """Pure-JAX reference (lax.scan) mirroring the PyTorch forward."""
    emb = jnp.take(params["embedding"], tokens, axis=0).astype(jnp.float32)
    T, B, E = emb.shape
    H = params["whr"].shape[0]

    def step(h, inp):
        x_t, t = inp
        r = jax.nn.sigmoid(x_t @ params["wir"] + h @ params["whr"] + params["br"])
        z = jax.nn.sigmoid(x_t @ params["wiz"] + h @ params["whz"] + params["bz"])
        n = jnp.tanh(x_t @ params["win"] + params["bin"]
                     + r * (h @ params["whn"] + params["bhn"]))
        h_new = (1.0 - z) * n + z * h
        valid = (t < lengths)[:, None]
        h_next = jnp.where(valid, h_new, h)
        out_h = jnp.where(valid, h_new, 0.0)
        return h_next, out_h

    h0 = jnp.zeros((B, H), jnp.float32)
    _, outs = lax.scan(step, h0, (emb, jnp.arange(T)))
    return outs @ params["wlin"] + params["blin"]


def init_params(key, vocab_size, num_tags, embedding_size, hidden_size):
    E, H = embedding_size, hidden_size
    ks = jax.random.split(key, 16)
    s = 1.0 / jnp.sqrt(H)

    def u(k, shape):
        return jax.random.uniform(k, shape, jnp.float32, -s, s)

    b_ir, b_iz, b_in = u(ks[8], (1, H)), u(ks[9], (1, H)), u(ks[10], (1, H))
    b_hr, b_hz, b_hn = u(ks[11], (1, H)), u(ks[12], (1, H)), u(ks[13], (1, H))
    return {
        "embedding": jax.random.normal(ks[0], (vocab_size, E), jnp.float32),
        # input-to-hidden weights, stored pre-transposed as (E, H)
        "wir": u(ks[1], (E, H)), "wiz": u(ks[2], (E, H)), "win": u(ks[3], (E, H)),
        # hidden-to-hidden weights, (H, H)
        "whr": u(ks[4], (H, H)), "whz": u(ks[5], (H, H)), "whn": u(ks[6], (H, H)),
        # r/z gate biases can be pre-summed; n-gate biases must stay separate
        "br": b_ir + b_hr, "bz": b_iz + b_hz, "bin": b_in, "bhn": b_hn,
        # output linear, (H, num_tags)
        "wlin": u(ks[7], (H, num_tags)),
        "blin": u(ks[14], (1, num_tags)),
    }


if __name__ == "__main__":
    vocab_size, num_tags = 50, 8
    embedding_size, hidden_size = 16, 32
    T, B = 8, 2

    key = jax.random.PRNGKey(0)
    k_params, k_tok = jax.random.split(key)
    params = init_params(k_params, vocab_size, num_tags, embedding_size, hidden_size)

    tokens = jax.random.randint(k_tok, (T, B), 0, vocab_size, dtype=jnp.int32)
    lengths = jnp.array([T, 5], dtype=jnp.int32)   # padded-sequence lengths

    # t_chunk=4 -> two time chunks, exercising the cross-chunk hidden-state carry.
    out = tagger_forward(tokens, lengths, params, t_chunk=4)
    out = jax.block_until_ready(out)

    ref = tagger_reference(tokens, lengths, params)
    assert out.shape == (T, B, num_tags)
    # bf16 weights/activations on the recurrence -> looser tolerance (per review).
    assert jnp.allclose(out, ref, atol=5e-2, rtol=5e-2), \
        f"max err {jnp.max(jnp.abs(out - ref))}"

    print("KERNEL_OK")
</pallas_src>

<mosaic_0001>
module attributes {stable_mosaic.version = 11 : i64} {
  func.func @gru_chunk_kernel(%arg0: i32, %arg1: i32, %arg2: memref<16x1xi32, #tpu.memory_space<vmem>>, %arg3: memref<4x16x128xbf16, #tpu.memory_space<vmem>>, %arg4: memref<128x384xbf16, #tpu.memory_space<vmem>>, %arg5: memref<1x384xf32, #tpu.memory_space<vmem>>, %arg6: memref<128x384xbf16, #tpu.memory_space<vmem>>, %arg7: memref<1x128xf32, #tpu.memory_space<vmem>>, %arg8: memref<4x16x128xf32, #tpu.memory_space<vmem>>, %arg9: memref<16x128xf32, #tpu.memory_space<vmem>>, %arg10: memref<4x16x384xf32, #tpu.memory_space<vmem>>) attributes {dimension_semantics = [#tpu.dimension_semantics<parallel>, #tpu.dimension_semantics<arbitrary>], iteration_bounds = array<i64: 1, 2>, scalar_prefetch = 0 : i64, scratch_operands = 2 : i64, tpu.core_type = #tpu.core_type<tc>, window_params = [{transform_indices = @transform_0, window_bounds = array<i64: 16, 1>}, {transform_indices = @transform_1, window_bounds = array<i64: 4, 16, 128>}, {pipeline_mode = #tpu.pipeline_mode<synchronous>, transform_indices = @transform_2, window_bounds = array<i64: 128, 384>}, {pipeline_mode = #tpu.pipeline_mode<synchronous>, transform_indices = @transform_3, window_bounds = array<i64: 1, 384>}, {pipeline_mode = #tpu.pipeline_mode<synchronous>, transform_indices = @transform_4, window_bounds = array<i64: 128, 384>}, {pipeline_mode = #tpu.pipeline_mode<synchronous>, transform_indices = @transform_5, window_bounds = array<i64: 1, 128>}, {transform_indices = @transform_6, window_bounds = array<i64: 4, 16, 128>}]} {
    %c0_i32 = arith.constant 0 : i32
    %0 = arith.cmpi eq, %arg1, %c0_i32 : i32
    %1 = arith.extui %0 : i1 to i32
    %c0_i32_0 = arith.constant 0 : i32
    %2 = arith.cmpi ne, %1, %c0_i32_0 : i32
    scf.if %2 {
      %cst_51 = arith.constant 0.000000e+00 : f32
      %193 = vector.broadcast %cst_51 : f32 to vector<16x128xf32>
      %c0_52 = arith.constant 0 : index
      %c0_53 = arith.constant 0 : index
      %194 = vector.load %arg9[%c0_52, %c0_53] : memref<16x128xf32, #tpu.memory_space<vmem>>, vector<16x128xf32>
      tpu.vector_store %arg9[%c0_52, %c0_53], %193 {strides = array<i32>} : memref<16x128xf32, #tpu.memory_space<vmem>>, vector<16x128xf32>,
    } else {
    }
    %c0 = arith.constant 0 : index
    %c0_1 = arith.constant 0 : index
    %c0_2 = arith.constant 0 : index
    %3 = vector.load %arg3[%c0, %c0_1, %c0_2] : memref<4x16x128xbf16, #tpu.memory_space<vmem>>, vector<4x16x128xbf16>
    %4 = vector.shape_cast %3 : vector<4x16x128xbf16> to vector<64x128xbf16>
    %c0_3 = arith.constant 0 : index
    %c0_4 = arith.constant 0 : index
    %5 = vector.load %arg4[%c0_3, %c0_4] : memref<128x384xbf16, #tpu.memory_space<vmem>>, vector<128x384xbf16>
    %cst = arith.constant dense<0.000000e+00> : vector<64x384xf32>
    %6 = tpu.matmul %4, %5, %cst {dimension_numbers = #tpu.dot_dimension_numbers<[1], [0], [0], [1], [0, 0, 1, 1], [], []>} : vector<64x128xbf16>, vector<128x384xbf16>, vector<64x384xf32> -> vector<64x384xf32>
    %c0_5 = arith.constant 0 : index
    %c0_6 = arith.constant 0 : index
    %7 = vector.load %arg5[%c0_5, %c0_6] : memref<1x384xf32, #tpu.memory_space<vmem>>, vector<1x384xf32>
    %8 = vector.broadcast %7 : vector<1x384xf32> to vector<64x384xf32>
    %9 = arith.addf %6, %8 : vector<64x384xf32>
    %10 = vector.shape_cast %9 : vector<64x384xf32> to vector<4x16x384xf32>
    %c0_7 = arith.constant 0 : index
    %c0_8 = arith.constant 0 : index
    %c0_9 = arith.constant 0 : index
    %11 = vector.load %arg10[%c0_7, %c0_8, %c0_9] : memref<4x16x384xf32, #tpu.memory_space<vmem>>, vector<4x16x384xf32>
    tpu.vector_store %arg10[%c0_7, %c0_8, %c0_9], %10 {strides = array<i32>} : memref<4x16x384xf32, #tpu.memory_space<vmem>>, vector<4x16x384xf32>,
    %c0_10 = arith.constant 0 : index
    %c0_11 = arith.constant 0 : index
    %12 = vector.load %arg2[%c0_10, %c0_11] : memref<16x1xi32, #tpu.memory_space<vmem>>, vector<16x1xi32>
    %c0_12 = arith.constant 0 : index
    %c0_13 = arith.constant 0 : index
    %13 = vector.load %arg6[%c0_12, %c0_13] : memref<128x384xbf16, #tpu.memory_space<vmem>>, vector<128x384xbf16>
    %c0_14 = arith.constant 0 : index
    %c0_15 = arith.constant 0 : index
    %14 = vector.load %arg7[%c0_14, %c0_15] : memref<1x128xf32, #tpu.memory_space<vmem>>, vector<1x128xf32>
    %15 = vector.shape_cast %14 : vector<1x128xf32> to vector<1x128xf32>
    %16 = vector.broadcast %15 : vector<1x128xf32> to vector<16x128xf32>
    %cst_16 = arith.constant 0.000000e+00 : f32
    %17 = vector.broadcast %cst_16 : f32 to vector<16x128xf32>
    %c4_i32 = arith.constant 4 : i32
    %18 = arith.muli %arg1, %c4_i32 : i32
    %c0_17 = arith.constant 0 : index
    %c0_18 = arith.constant 0 : index
    %19 = vector.load %arg9[%c0_17, %c0_18] : memref<16x128xf32, #tpu.memory_space<vmem>>, vector<16x128xf32>
    %c0_i32_19 = arith.constant 0 : i32
    %20 = arith.index_cast %c0_i32_19 : i32 to index
    %c0_20 = arith.constant 0 : index
    %c0_21 = arith.constant 0 : index
    %21 = vector.load %arg10[%20, %c0_20, %c0_21] : memref<4x16x384xf32, #tpu.memory_space<vmem>>, vector<1x16x384xf32>
    %22 = vector.shape_cast %21 : vector<1x16x384xf32> to vector<16x384xf32>
    %23 = arith.truncf %19 : vector<16x128xf32> to vector<16x128xbf16>
    %cst_22 = arith.constant dense<0.000000e+00> : vector<16x384xf32>
    %24 = tpu.matmul %23, %13, %cst_22 {dimension_numbers = #tpu.dot_dimension_numbers<[1], [0], [0], [1], [0, 0, 1, 1], [], []>} : vector<16x128xbf16>, vector<128x384xbf16>, vector<16x384xf32> -> vector<16x384xf32>
    %25 = vector.extract_strided_slice %22 {offsets = [0, 0], sizes = [16, 128], strides = [1, 1]} : vector<16x384xf32> to vector<16x128xf32>
    %26 = vector.extract_strided_slice %24 {offsets = [0, 0], sizes = [16, 128], strides = [1, 1]} : vector<16x384xf32> to vector<16x128xf32>
    %27 = arith.addf %25, %26 : vector<16x128xf32>
    %28 = arith.negf %27 : vector<16x128xf32>
    %29 = math.exp %28 : vector<16x128xf32>
    %cst_23 = arith.constant 1.000000e+00 : f32
    %30 = vector.broadcast %cst_23 : f32 to vector<16x128xf32>
    %31 = arith.addf %30, %29 : vector<16x128xf32>
    %32 = arith.divf %30, %31 : vector<16x128xf32>
    %33 = vector.extract_strided_slice %22 {offsets = [0, 128], sizes = [16, 128], strides = [1, 1]} : vector<16x384xf32> to vector<16x128xf32>
    %34 = vector.extract_strided_slice %24 {offsets = [0, 128], sizes = [16, 128], strides = [1, 1]} : vector<16x384xf32> to vector<16x128xf32>
    %35 = arith.addf %33, %34 : vector<16x128xf32>
    %36 = arith.negf %35 : vector<16x128xf32>
    %37 = math.exp %36 : vector<16x128xf32>
    %cst_24 = arith.constant 1.000000e+00 : f32
    %38 = vector.broadcast %cst_24 : f32 to vector<16x128xf32>
    %39 = arith.addf %38, %37 : vector<16x128xf32>
    %40 = arith.divf %38, %39 : vector<16x128xf32>
    %41 = vector.extract_strided_slice %22 {offsets = [0, 256], sizes = [16, 128], strides = [1, 1]} : vector<16x384xf32> to vector<16x128xf32>
    %42 = vector.extract_strided_slice %24 {offsets = [0, 256], sizes = [16, 128], strides = [1, 1]} : vector<16x384xf32> to vector<16x128xf32>
    %43 = arith.addf %42, %16 : vector<16x128xf32>
    %44 = arith.mulf %32, %43 : vector<16x128xf32>
    %45 = arith.addf %41, %44 : vector<16x128xf32>
    %46 = math.tanh %45 : vector<16x128xf32>
    %47 = arith.subf %19, %46 : vector<16x128xf32>
    %48 = arith.mulf %40, %47 : vector<16x128xf32>
    %49 = arith.addf %46, %48 : vector<16x128xf32>
    %50 = arith.addi %18, %c0_i32_19 : i32
    %51 = vector.broadcast %50 : i32 to vector<16x1xi32>
    %52 = arith.cmpi slt, %51, %12 : vector<16x1xi32>
    %53 = vector.shape_cast %52 : vector<16x1xi1> to vector<16x1xi1>
    %54 = vector.broadcast %53 : vector<16x1xi1> to vector<16x128xi1>
    %55 = arith.select %54, %49, %17 : vector<16x128xi1>, vector<16x128xf32>
    %56 = arith.index_cast %c0_i32_19 : i32 to index
    %c0_25 = arith.constant 0 : index
    %c0_26 = arith.constant 0 : index
    %57 = vector.load %arg8[%56, %c0_25, %c0_26] : memref<4x16x128xf32, #tpu.memory_space<vmem>>, vector<1x16x128xf32>
    %58 = vector.shape_cast %57 : vector<1x16x128xf32> to vector<16x128xf32>
    %59 = vector.shape_cast %55 : vector<16x128xf32> to vector<1x16x128xf32>
    tpu.vector_store %arg8[%56, %c0_25, %c0_26], %59 {strides = array<i32>} : memref<4x16x128xf32, #tpu.memory_space<vmem>>, vector<1x16x128xf32>,
    %60 = vector.shape_cast %52 : vector<16x1xi1> to vector<16x1xi1>
    %61 = vector.broadcast %60 : vector<16x1xi1> to vector<16x128xi1>
    %62 = arith.select %61, %49, %19 : vector<16x128xi1>, vector<16x128xf32>
    %c1_i32 = arith.constant 1 : i32
    %63 = arith.index_cast %c1_i32 : i32 to index
    %c0_27 = arith.constant 0 : index
    %c0_28 = arith.constant 0 : index
    %64 = vector.load %arg10[%63, %c0_27, %c0_28] : memref<4x16x384xf32, #tpu.memory_space<vmem>>, vector<1x16x384xf32>
    %65 = vector.shape_cast %64 : vector<1x16x384xf32> to vector<16x384xf32>
    %66 = arith.truncf %62 : vector<16x128xf32> to vector<16x128xbf16>
    %cst_29 = arith.constant dense<0.000000e+00> : vector<16x384xf32>
    %67 = tpu.matmul %66, %13, %cst_29 {dimension_numbers = #tpu.dot_dimension_numbers<[1], [0], [0], [1], [0, 0, 1, 1], [], []>} : vector<16x128xbf16>, vector<128x384xbf16>, vector<16x384xf32> -> vector<16x384xf32>
    %68 = vector.extract_strided_slice %65 {offsets = [0, 0], sizes = [16, 128], strides = [1, 1]} : vector<16x384xf32> to vector<16x128xf32>
    %69 = vector.extract_strided_slice %67 {offsets = [0, 0], sizes = [16, 128], strides = [1, 1]} : vector<16x384xf32> to vector<16x128xf32>
    %70 = arith.addf %68, %69 : vector<16x128xf32>
    %71 = arith.negf %70 : vector<16x128xf32>
    %72 = math.exp %71 : vector<16x128xf32>
    %cst_30 = arith.constant 1.000000e+00 : f32
    %73 = vector.broadcast %cst_30 : f32 to vector<16x128xf32>
    %74 = arith.addf %73, %72 : vector<16x128xf32>
    %75 = arith.divf %73, %74 : vector<16x128xf32>
    %76 = vector.extract_strided_slice %65 {offsets = [0, 128], sizes = [16, 128], strides = [1, 1]} : vector<16x384xf32> to vector<16x128xf32>
    %77 = vector.extract_strided_slice %67 {offsets = [0, 128], sizes = [16, 128], strides = [1, 1]} : vector<16x384xf32> to vector<16x128xf32>
    %78 = arith.addf %76, %77 : vector<16x128xf32>
    %79 = arith.negf %78 : vector<16x128xf32>
    %80 = math.exp %79 : vector<16x128xf32>
    %cst_31 = arith.constant 1.000000e+00 : f32
    %81 = vector.broadcast %cst_31 : f32 to vector<16x128xf32>
    %82 = arith.addf %81, %80 : vector<16x128xf32>
    %83 = arith.divf %81, %82 : vector<16x128xf32>
    %84 = vector.extract_strided_slice %65 {offsets = [0, 256], sizes = [16, 128], strides = [1, 1]} : vector<16x384xf32> to vector<16x128xf32>
    %85 = vector.extract_strided_slice %67 {offsets = [0, 256], sizes = [16, 128], strides = [1, 1]} : vector<16x384xf32> to vector<16x128xf32>
    %86 = arith.addf %85, %16 : vector<16x128xf32>
    %87 = arith.mulf %75, %86 : vector<16x128xf32>
    %88 = arith.addf %84, %87 : vector<16x128xf32>
    %89 = math.tanh %88 : vector<16x128xf32>
    %90 = arith.subf %62, %89 : vector<16x128xf32>
    %91 = arith.mulf %83, %90 : vector<16x128xf32>
    %92 = arith.addf %89, %91 : vector<16x128xf32>
    %93 = arith.addi %18, %c1_i32 : i32
    %94 = vector.broadcast %93 : i32 to vector<16x1xi32>
    %95 = arith.cmpi slt, %94, %12 : vector<16x1xi32>
    %96 = vector.shape_cast %95 : vector<16x1xi1> to vector<16x1xi1>
    %97 = vector.broadcast %96 : vector<16x1xi1> to vector<16x128xi1>
    %98 = arith.select %97, %92, %17 : vector<16x128xi1>, vector<16x128xf32>
    %99 = arith.index_cast %c1_i32 : i32 to index
    %c0_32 = arith.constant 0 : index
    %c0_33 = arith.constant 0 : index
    %100 = vector.load %arg8[%99, %c0_32, %c0_33] : memref<4x16x128xf32, #tpu.memory_space<vmem>>, vector<1x16x128xf32>
    %101 = vector.shape_cast %100 : vector<1x16x128xf32> to vector<16x128xf32>
    %102 = vector.shape_cast %98 : vector<16x128xf32> to vector<1x16x128xf32>
    tpu.vector_store %arg8[%99, %c0_32, %c0_33], %102 {strides = array<i32>} : memref<4x16x128xf32, #tpu.memory_space<vmem>>, vector<1x16x128xf32>,
    %103 = vector.shape_cast %95 : vector<16x1xi1> to vector<16x1xi1>
    %104 = vector.broadcast %103 : vector<16x1xi1> to vector<16x128xi1>
    %105 = arith.select %104, %92, %62 : vector<16x128xi1>, vector<16x128xf32>
    %c2_i32 = arith.constant 2 : i32
    %106 = arith.index_cast %c2_i32 : i32 to index
    %c0_34 = arith.constant 0 : index
    %c0_35 = arith.constant 0 : index
    %107 = vector.load %arg10[%106, %c0_34, %c0_35] : memref<4x16x384xf32, #tpu.memory_space<vmem>>, vector<1x16x384xf32>
    %108 = vector.shape_cast %107 : vector<1x16x384xf32> to vector<16x384xf32>
    %109 = arith.truncf %105 : vector<16x128xf32> to vector<16x128xbf16>
    %cst_36 = arith.constant dense<0.000000e+00> : vector<16x384xf32>
    %110 = tpu.matmul %109, %13, %cst_36 {dimension_numbers = #tpu.dot_dimension_numbers<[1], [0], [0], [1], [0, 0, 1, 1], [], []>} : vector<16x128xbf16>, vector<128x384xbf16>, vector<16x384xf32> -> vector<16x384xf32>
    %111 = vector.extract_strided_slice %108 {offsets = [0, 0], sizes = [16, 128], strides = [1, 1]} : vector<16x384xf32> to vector<16x128xf32>
    %112 = vector.extract_strided_slice %110 {offsets = [0, 0], sizes = [16, 128], strides = [1, 1]} : vector<16x384xf32> to vector<16x128xf32>
    %113 = arith.addf %111, %112 : vector<16x128xf32>
    %114 = arith.negf %113 : vector<16x128xf32>
    %115 = math.exp %114 : vector<16x128xf32>
    %cst_37 = arith.constant 1.000000e+00 : f32
    %116 = vector.broadcast %cst_37 : f32 to vector<16x128xf32>
    %117 = arith.addf %116, %115 : vector<16x128xf32>
    %118 = arith.divf %116, %117 : vector<16x128xf32>
    %119 = vector.extract_strided_slice %108 {offsets = [0, 128], sizes = [16, 128], strides = [1, 1]} : vector<16x384xf32> to vector<16x128xf32>
    %120 = vector.extract_strided_slice %110 {offsets = [0, 128], sizes = [16, 128], strides = [1, 1]} : vector<16x384xf32> to vector<16x128xf32>
    %121 = arith.addf %119, %120 : vector<16x128xf32>
    %122 = arith.negf %121 : vector<16x128xf32>
    %123 = math.exp %122 : vector<16x128xf32>
    %cst_38 = arith.constant 1.000000e+00 : f32
    %124 = vector.broadcast %cst_38 : f32 to vector<16x128xf32>
    %125 = arith.addf %124, %123 : vector<16x128xf32>
    %126 = arith.divf %124, %125 : vector<16x128xf32>
    %127 = vector.extract_strided_slice %108 {offsets = [0, 256], sizes = [16, 128], strides = [1, 1]} : vector<16x384xf32> to vector<16x128xf32>
    %128 = vector.extract_strided_slice %110 {offsets = [0, 256], sizes = [16, 128], strides = [1, 1]} : vector<16x384xf32> to vector<16x128xf32>
    %129 = arith.addf %128, %16 : vector<16x128xf32>
    %130 = arith.mulf %118, %129 : vector<16x128xf32>
    %131 = arith.addf %127, %130 : vector<16x128xf32>
    %132 = math.tanh %131 : vector<16x128xf32>
    %133 = arith.subf %105, %132 : vector<16x128xf32>
    %134 = arith.mulf %126, %133 : vector<16x128xf32>
    %135 = arith.addf %132, %134 : vector<16x128xf32>
    %136 = arith.addi %18, %c2_i32 : i32
    %137 = vector.broadcast %136 : i32 to vector<16x1xi32>
    %138 = arith.cmpi slt, %137, %12 : vector<16x1xi32>
    %139 = vector.shape_cast %138 : vector<16x1xi1> to vector<16x1xi1>
    %140 = vector.broadcast %139 : vector<16x1xi1> to vector<16x128xi1>
    %141 = arith.select %140, %135, %17 : vector<16x128xi1>, vector<16x128xf32>
    %142 = arith.index_cast %c2_i32 : i32 to index
    %c0_39 = arith.constant 0 : index
    %c0_40 = arith.constant 0 : index
    %143 = vector.load %arg8[%142, %c0_39, %c0_40] : memref<4x16x128xf32, #tpu.memory_space<vmem>>, vector<1x16x128xf32>
    %144 = vector.shape_cast %143 : vector<1x16x128xf32> to vector<16x128xf32>
    %145 = vector.shape_cast %141 : vector<16x128xf32> to vector<1x16x128xf32>
    tpu.vector_store %arg8[%142, %c0_39, %c0_40], %145 {strides = array<i32>} : memref<4x16x128xf32, #tpu.memory_space<vmem>>, vector<1x16x128xf32>,
    %146 = vector.shape_cast %138 : vector<16x1xi1> to vector<16x1xi1>
    %147 = vector.broadcast %146 : vector<16x1xi1> to vector<16x128xi1>
    %148 = arith.select %147, %135, %105 : vector<16x128xi1>, vector<16x128xf32>
    %c3_i32 = arith.constant 3 : i32
    %149 = arith.index_cast %c3_i32 : i32 to index
    %c0_41 = arith.constant 0 : index
    %c0_42 = arith.constant 0 : index
    %150 = vector.load %arg10[%149, %c0_41, %c0_42] : memref<4x16x384xf32, #tpu.memory_space<vmem>>, vector<1x16x384xf32>
    %151 = vector.shape_cast %150 : vector<1x16x384xf32> to vector<16x384xf32>
    %152 = arith.truncf %148 : vector<16x128xf32> to vector<16x128xbf16>
    %cst_43 = arith.constant dense<0.000000e+00> : vector<16x384xf32>
    %153 = tpu.matmul %152, %13, %cst_43 {dimension_numbers = #tpu.dot_dimension_numbers<[1], [0], [0], [1], [0, 0, 1, 1], [], []>} : vector<16x128xbf16>, vector<128x384xbf16>, vector<16x384xf32> -> vector<16x384xf32>
    %154 = vector.extract_strided_slice %151 {offsets = [0, 0], sizes = [16, 128], strides = [1, 1]} : vector<16x384xf32> to vector<16x128xf32>
    %155 = vector.extract_strided_slice %153 {offsets = [0, 0], sizes = [16, 128], strides = [1, 1]} : vector<16x384xf32> to vector<16x128xf32>
    %156 = arith.addf %154, %155 : vector<16x128xf32>
    %157 = arith.negf %156 : vector<16x128xf32>
    %158 = math.exp %157 : vector<16x128xf32>
    %cst_44 = arith.constant 1.000000e+00 : f32
    %159 = vector.broadcast %cst_44 : f32 to vector<16x128xf32>
    %160 = arith.addf %159, %158 : vector<16x128xf32>
    %161 = arith.divf %159, %160 : vector<16x128xf32>
    %162 = vector.extract_strided_slice %151 {offsets = [0, 128], sizes = [16, 128], strides = [1, 1]} : vector<16x384xf32> to vector<16x128xf32>
    %163 = vector.extract_strided_slice %153 {offsets = [0, 128], sizes = [16, 128], strides = [1, 1]} : vector<16x384xf32> to vector<16x128xf32>
    %164 = arith.addf %162, %163 : vector<16x128xf32>
    %165 = arith.negf %164 : vector<16x128xf32>
    %166 = math.exp %165 : vector<16x128xf32>
    %cst_45 = arith.constant 1.000000e+00 : f32
    %167 = vector.broadcast %cst_45 : f32 to vector<16x128xf32>
    %168 = arith.addf %167, %166 : vector<16x128xf32>
    %169 = arith.divf %167, %168 : vector<16x128xf32>
    %170 = vector.extract_strided_slice %151 {offsets = [0, 256], sizes = [16, 128], strides = [1, 1]} : vector<16x384xf32> to vector<16x128xf32>
    %171 = vector.extract_strided_slice %153 {offsets = [0, 256], sizes = [16, 128], strides = [1, 1]} : vector<16x384xf32> to vector<16x128xf32>
    %172 = arith.addf %171, %16 : vector<16x128xf32>
    %173 = arith.mulf %161, %172 : vector<16x128xf32>
    %174 = arith.addf %170, %173 : vector<16x128xf32>
    %175 = math.tanh %174 : vector<16x128xf32>
    %176 = arith.subf %148, %175 : vector<16x128xf32>
    %177 = arith.mulf %169, %176 : vector<16x128xf32>
    %178 = arith.addf %175, %177 : vector<16x128xf32>
    %179 = arith.addi %18, %c3_i32 : i32
    %180 = vector.broadcast %179 : i32 to vector<16x1xi32>
    %181 = arith.cmpi slt, %180, %12 : vector<16x1xi32>
    %182 = vector.shape_cast %181 : vector<16x1xi1> to vector<16x1xi1>
    %183 = vector.broadcast %182 : vector<16x1xi1> to vector<16x128xi1>
    %184 = arith.select %183, %178, %17 : vector<16x128xi1>, vector<16x128xf32>
    %185 = arith.index_cast %c3_i32 : i32 to index
    %c0_46 = arith.constant 0 : index
    %c0_47 = arith.constant 0 : index
    %186 = vector.load %arg8[%185, %c0_46, %c0_47] : memref<4x16x128xf32, #tpu.memory_space<vmem>>, vector<1x16x128xf32>
    %187 = vector.shape_cast %186 : vector<1x16x128xf32> to vector<16x128xf32>
    %188 = vector.shape_cast %184 : vector<16x128xf32> to vector<1x16x128xf32>
    tpu.vector_store %arg8[%185, %c0_46, %c0_47], %188 {strides = array<i32>} : memref<4x16x128xf32, #tpu.memory_space<vmem>>, vector<1x16x128xf32>,
    %189 = vector.shape_cast %181 : vector<16x1xi1> to vector<16x1xi1>
    %190 = vector.broadcast %189 : vector<16x1xi1> to vector<16x128xi1>
    %191 = arith.select %190, %178, %148 : vector<16x128xi1>, vector<16x128xf32>
    %c4_i32_48 = arith.constant 4 : i32
    %c0_49 = arith.constant 0 : index
    %c0_50 = arith.constant 0 : index
    %192 = vector.load %arg9[%c0_49, %c0_50] : memref<16x128xf32, #tpu.memory_space<vmem>>, vector<16x128xf32>
    tpu.vector_store %arg9[%c0_49, %c0_50], %191 {strides = array<i32>} : memref<16x128xf32, #tpu.memory_space<vmem>>, vector<16x128xf32>,
    return
  }
  func.func @transform_0(%arg0: i32, %arg1: i32) -> (i32, i32) {
    %c0_i32 = arith.constant 0 : i32
    %c0_i32_0 = arith.constant 0 : i32
    return %arg0, %c0_i32 : i32, i32
  }
  func.func @transform_1(%arg0: i32, %arg1: i32) -> (i32, i32, i32) {
    %c0_i32 = arith.constant 0 : i32
    %c0_i32_0 = arith.constant 0 : i32
    return %arg1, %arg0, %c0_i32 : i32, i32, i32
  }
  func.func @transform_2(%arg0: i32, %arg1: i32) -> (i32, i32) {
    %c0_i32 = arith.constant 0 : i32
    %c0_i32_0 = arith.constant 0 : i32
    %c0_i32_1 = arith.constant 0 : i32
    return %c0_i32, %c0_i32_0 : i32, i32
  }
  func.func @transform_3(%arg0: i32, %arg1: i32) -> (i32, i32) {
    %c0_i32 = arith.constant 0 : i32
    %c0_i32_0 = arith.constant 0 : i32
    %c0_i32_1 = arith.constant 0 : i32
    return %c0_i32, %c0_i32_0 : i32, i32
  }
  func.func @transform_4(%arg0: i32, %arg1: i32) -> (i32, i32) {
    %c0_i32 = arith.constant 0 : i32
    %c0_i32_0 = arith.constant 0 : i32
    %c0_i32_1 = arith.constant 0 : i32
    return %c0_i32, %c0_i32_0 : i32, i32
  }
  func.func @transform_5(%arg0: i32, %arg1: i32) -> (i32, i32) {
    %c0_i32 = arith.constant 0 : i32
    %c0_i32_0 = arith.constant 0 : i32
    %c0_i32_1 = arith.constant 0 : i32
    return %c0_i32, %c0_i32_0 : i32, i32
  }
  func.func @transform_6(%arg0: i32, %arg1: i32) -> (i32, i32, i32) {
    %c0_i32 = arith.constant 0 : i32
    %c0_i32_0 = arith.constant 0 : i32
    return %arg1, %arg0, %c0_i32 : i32, i32, i32
  }
}

</mosaic_0001>

<bundles_post_ra>
// kernel: tpu_custom_call.1
= control target key start
LH: loop header
LB: loop body
LE: loop exit
PB: predicated region body
PF: predicated region fallthrough
CT: control target
= control target key end

     0   :  { %s2932_s0 = inlined_call_operand.vmem [shape: s32[16,1], index: 0, kind: input, shape index: {}]   ;;  %s2933_s1 = inlined_call_operand.hbm [shape: bf16[8,16,128], index: 1, kind: input, shape index: {}]   ;;  %s2934_s2 = inlined_call_operand.hbm [shape: bf16[128,384], index: 2, kind: input, shape index: {}]   ;;  %s2935_s3 = inlined_call_operand.vmem [shape: f32[1,384], index: 3, kind: input, shape index: {}]   ;;  %s2936_s4 = inlined_call_operand.hbm [shape: bf16[128,384], index: 4, kind: input, shape index: {}]   ;;  %s2937_s5 = inlined_call_operand.vmem [shape: f32[1,128], index: 5, kind: input, shape index: {}]   ;;  %s2938_s6 = inlined_call_operand.hbm [shape: f32[8,16,128], index: 6, kind: output, shape index: {}]  }
   0x1   :  { %2946 = sst [smem:[#allocation22_spill]] %s2934_s2 }
   0x2   :  { %2947 = sst [smem:[#allocation23_spill]] %s2936_s4 }
   0x3   :  { %11 = vsyncpa [#allocation5], 0 }
   0x4   :  { %13 = vsyncpa [#allocation5 + $0x1], 0 }
   0x5   :  { %14 = vsyncpa [#allocation8], 0 }
   0x6   :  { %15 = vsyncpa [#allocation6], 0 }
   0x7   :  { %17 = vsyncpa [#allocation6 + $0x1], 0  ;;  %s2364_s21 = smov 0   ;;  %s2366_s22 = smov 0  }
   0x8   :  { %s2368_s23 = smov 0   ;;  %s2370_s24 = smov 0  }
   0x9   :  { %s2372_s25 = smov 0   ;;  %s2374_s26 = smov 0  }
   0xa LB: > { %s1651_s27 = sadd.s32 4294967295, %s2313_s26   ;;  %s1652_s28 = sadd.s32 4294967294, %s2313_s26   ;;  %s2313_s26 = sphi %s2374_s26, %s23_s26   ;;  %s2309_s25 = sphi %s2372_s25, %s2984_s25   ;;  %s2305_s24 = sphi %s2370_s24, %s2983_s24   ;;  %s2301_s23 = sphi %s2368_s23, %s2982_s23   ;;  %s2297_s22 = sphi %s2366_s22, %s2981_s22   ;;  %s2293_s21 = sphi %s2364_s21, %s2980_s21  }
   0xb   : > { %p83_p0 = scmp.ne.s32.totalorder %s2297_s22, %s2293_s21  ;;  %p2398_p1 = scmp.eq.s32.totalorder %s1651_s27, 0 }
   0xc   : > { %p2402_p2 = scmp.eq.s32.totalorder %s1651_s27, 1  ;;  %p199_p3 = scmp.eq.s32.totalorder %s1652_s28, 1 }
   0xd   : > { %s2948_s29 = scalar_select %p2398_p1, 1, 0 }
   0xe   : > { %p2408_p4 = por %p2398_p1, %p83_p0  ;;  %p1653_p5 = scmp.ge.s32.totalorder %s2313_s26, 1 }
   0xf   : > { %p2413_p6 = por %p199_p3, %p83_p0  ;;  %p206_p7 = scmp.lt.s32.totalorder %s2313_s26, 3 }
  0x10   : > { %s2950_s7 = scalar_select %p2408_p4, 1, 0 }
  0x11   : > { %s2951_s8 = scalar_select %p2413_p6, 1, 0 }
  0x12   : > { %p2418_p8 = pnand %p1653_p5, %p206_p7  ;;  %s2315_s10 = smov [#allocation7]  }
  0x13   : > { %s227_s11 = sshll.u32 %s2315_s10, 4  ;;  %s2316_s13 = smov [#allocation9]   ;;  %s228_s11 = int_to_ptr.vmem [resolvable:$true] %s227_s11 }
  0x14   : > { %p1918_p9 = pneg %p2418_p8  ;;  %s243_s14 = sshll.u32 %s2316_s13, 4  ;;  %s244_s14 = int_to_ptr.vmem [resolvable:$true] %s243_s14 }
  0x15   : > { %s2160_s15 = scalar_lea.vmem %s228_s11, 3072  ;;  %p2168_p5 = scmp.lt.s32.totalorder %s228_s11, %s228_s11 }
  0x16   : > { %p2427_p11 = pnand %p1918_p9, %p2398_p1  ;;  %p2161_p13 = scmp.ne.s32.totalorder %s228_s11, %s2160_s15 }
  0x17   : > { %p2169_p7 = scmp.lt.s32.totalorder %s2160_s15, %s2160_s15 }
  0x18   : > { %p2151_p12 = pneg %p2427_p11 }
  0x19   : > { %p2170_p10 = por %p2169_p7, %p2168_p5 }
  0x1a   : > { %p2163_p0 = pnand %p2161_p13, %p2151_p12 }
  0x1c   : > { %p2164_p3 = pneg %p2163_p0 }
  0x1e   : > { %p2171_p9 = pnand %p2170_p10, %p2164_p3 }
  0x20   : > { %2174 = shalt.err (!%p2171_p9)
}
  0x21   : > { %s2317_s16 = smov 192   ;;  %s2318_s17 = smov 12  }
  0x22   : > { %s2954_s2 = sld [smem:[#allocation22_spill]]  ;;  %s2186_s20 = scalar_lea.vmem %s244_s14, 3072 }
  0x23   : > { %p2187_p6 = scmp.ne.s32.totalorder %s244_s14, %s2186_s20  ;;  %p2194_p1 = scmp.lt.s32.totalorder %s244_s14, %s244_s14 }
  0x24   : > { %p2195_p4 = scmp.lt.s32.totalorder %s2186_s20, %s2186_s20 }
  0x25   : > { %p2189_p13 = pnand %p2187_p6, %p2151_p12 }
  0x26   : > { %p2196_p5 = por %p2195_p4, %p2194_p1 }
  0x27   : > { %p2190_p0 = pneg %p2189_p13 }
  0x28   : > { %1921 = dma.hbm_to_vmem [thread:$0]  (!%p2427_p11), %s2954_s2, 3072, %s228_s11, [#allocation8], %s2317_s16, %s2317_s16, %s2318_s17  }
  0x29   : > { %p2197_p10 = pnand %p2196_p5, %p2190_p0 }
  0x2b   : > { %2200 = shalt.err (!%p2197_p10)
}
  0x2c   : > { %s2955_s4 = sld [smem:[#allocation23_spill]]  ;;  %s32_s10 = sadd.s32 1, %s2309_s25 }
  0x2d   : > { %s70_s11 = sadd.s32 1, %s2301_s23  ;;  %p33_p1 = scmp.ge.s32.totalorder %s32_s10, 2 }
  0x2e   : > { %p77_p4 = scmp.ne.s32.totalorder %s2301_s23, %s2297_s22  ;;  %p78_p6 = scmp.eq.s32.totalorder %s2313_s26, 0 }
  0x2f   : > { %p1935_p12 = scmp.lt.s32.totalorder %s2313_s26, 2  ;;  %s2986_s10 = smov (%p33_p1, %s32_s10), 0 }
  0x30   : > { %p79_p3 = por %p78_p6, %p77_p4  ;;  %p2459_p7 = por %p2402_p2, %p77_p4 }
  0x31   : > { %s65_s13 = ssub.s32 %s2309_s25, %s2986_s10  ;;  %s260_s15 = sand.u32 1, %s2301_s23  }
  0x32   : > { %1924 = dma.hbm_to_vmem [thread:$0]  (!%p2427_p11), %s2955_s4, 3072, %s244_s14, [#allocation8], %s2317_s16, %s2317_s16, %s2318_s17  }
  0x33   : > { %p68_p9 = scmp.eq.s32.totalorder %s65_s13, 0  ;;  %s1658_s14 = sshll.u32 %s260_s15, 5 }
  0x34   : > { %s1751_s16 = sshll.u32 %s2309_s25, 9  ;;  %s264_s27 = scalar_lea.vmem [#allocation4], %s1658_s14 }
  0x35   : > { %s2468_s17 = scalar_select %p68_p9, %s2301_s23, %s70_s11  }
  0x36   : > { %s273_s20 = scalar_lea.hbm %s2933_s1, %s1751_s16  ;;  %s274_s28 = sshll.u32 %s264_s27, 4  ;;  %s275_s28 = int_to_ptr.vmem [resolvable:$true] %s274_s28 }
  0x37   : > { %p2475_p11 = pnand %p1935_p12, %p79_p3  ;;  %s261_s2 = scalar_lea.sflag [#allocation5], %s260_s15 }
  0x38   : > { %s2214_s13 = scalar_lea.vmem %s275_s28, 512  ;;  %s2319_s11 = smov [#allocation4]  }
  0x39   : > { %p2203_p2 = pneg %p2475_p11  ;;  %p2215_p13 = scmp.ne.s32.totalorder %s275_s28, %s2214_s13 }
  0x3a   : > { %s2219_s4 = sshll.u32 %s2319_s11, 4  ;;  %s2220_s4 = int_to_ptr.vmem [resolvable:$false] %s2219_s4 }
  0x3b   : > { %p2217_p0 = pnand %p2215_p13, %p2203_p2  ;;  %s2221_s16 = scalar_lea.vmem %s2220_s4, 1024 }
  0x3c   : > { %p2222_p10 = scmp.lt.s32.totalorder %s275_s28, %s2220_s4  ;;  %p2223_p1 = scmp.lt.s32.totalorder %s2221_s16, %s2214_s13 }
  0x3d   : > { %p2218_p5 = pneg %p2217_p0 }
  0x3e   : > { %p2224_p4 = por %p2223_p1, %p2222_p10 }
  0x40   : > { %p2225_p6 = pnand %p2224_p4, %p2218_p5 }
  0x42   : > { %2228 = shalt.err (!%p2225_p6)
}
  0x43   : > { %s2320_s14 = smov 64   ;;  %s2321_s18 = smov 4  }
  0x44   : > { %1928 = dma.hbm_to_vmem [thread:$0]  (!%p2475_p11), %s273_s20, 512, %s275_s28, %s261_s2, %s2320_s14, %s2320_s14, %s2321_s18  }
  0x45   : > { %286 = sbr.rel (%p2418_p8) target bundleno = 1200 (0x4b0), region = 44 }
  0x4a   : > { %s2486_s15 = sand.u32 1, %s2297_s22   ;;  %p2958_p12 = scmp.ne.s32.totalorder %s2950_s7, 0 }
  0x4b   : > { %s1663_s19 = sshll.u32 %s2486_s15, 5  ;;  %s289_s4 = scalar_lea.sflag [#allocation5], %s2486_s15 }
  0x4c   : > { %s2490_s27 = scalar_lea.vmem [#allocation4], %s1663_s19 }
  0x4d   : > { %2280 = dma.done.wait (%p2958_p12), %s289_s4, 512  }
  0x4e   : > { %2282 = vsyncadd (%p2958_p12), %s289_s4, 4294966784  ;;  %p2959_p3 = scmp.ne.s32.totalorder %s2948_s29, 0 }
  0x50   : > { %2284 = dma.done.wait (%p2959_p3), [#allocation8], 6144  }
  0x51   : > { %2286 = vsyncadd (%p2959_p3), [#allocation8], 4294961152  ;;  %s1666_s2 = sshll.u32 %s2486_s15, 6  ;;  %p1667_p8 = scmp.ne.s32.totalorder %s2305_s24, 0 }
  0x52   : > { %s2501_s9 = scalar_lea.vmem [#allocation10], %s1666_s2 }
  0x53   : > { %348 = sbr.rel (%p1667_p8) target bundleno = 90 (0x5a), region = 60 }
  0x58   : > { %v2322_v0 = vmov 0.0  }
  0x59   : > { %349 = vst [vmem:[#allocation2] sm:$0xff] %v2322_v0  ;;  %350 = vst [vmem:[#allocation2 + $0x8] sm:$0xff] %v2322_v0 }
  0x5a PF: > { %v2001_v1 = vld [vmem:[#allocation7 + $0xac] ss:$12 sps:$4 sm:$0xff]   ;;  %v2003_v2 = vld [vmem:[#allocation7 + $0xa8] ss:$12 sps:$4 sm:$0xff]   ;;  %v2942_v3 = vmov 0   ;;  %v2027_v13 = vld [vmem:[%s2490_s27] sm:$0xff]  }
  0x5b   : > { %592 = vmatprep.mubr.bf16.mxu0 %v2942_v3  ;;  %1999 = vset.pattern.permute.xlu0 %v2942_v3  ;;  %v2004_v4 = vld [vmem:[#allocation7 + $0x94] ss:$12 sps:$4 sm:$0xff]   ;;  %v2006_v5 = vld [vmem:[#allocation7 + $0x90] ss:$12 sps:$4 sm:$0xff]   ;;  %v2009_v7 = vld [vmem:[#allocation7 + $0x78] ss:$12 sps:$4 sm:$0xff]  }
  0x5c   : > { %560 = vmatprep.subr.bf16.mxu0 %v2001_v1  ;;  %2000 = vset.pattern.permute.xlu1 %v2942_v3  ;;  %v2007_v6 = vld [vmem:[#allocation7 + $0x7c] ss:$12 sps:$4 sm:$0xff]   ;;  %v2010_v8 = vld [vmem:[#allocation7 + $0x64] ss:$12 sps:$4 sm:$0xff]   ;;  %v2012_v10 = vld [vmem:[#allocation7 + $0x60] ss:$12 sps:$4 sm:$0xff]  }
  0x5d   : > { %561 = vmatpush1.bf16.msra.mxu0 %v2003_v2  ;;  %v2022_v9 = vld [vmem:[#allocation7 + $0xb0] ss:$12 sps:$4 sm:$0xff]   ;;  %v2013_v11 = vld [vmem:[#allocation7 + $0x4c] ss:$12 sps:$4 sm:$0xff]   ;;  %v2015_v14 = vld [vmem:[#allocation7 + $0x48] ss:$12 sps:$4 sm:$0xff]   ;;  %1818 = vmatprep.mubr.bf16.mxu1 %v2027_v13 }
  0x5e   : > { %562 = vmatprep.subr.bf16.mxu0 %v2004_v4  ;;  %1802 = vmatprep.subr.bf16.mxu1 %v2022_v9  ;;  %v2026_v12 = vld [vmem:[#allocation7 + $0x98] ss:$12 sps:$4 sm:$0xff]   ;;  %v2031_v15 = vld [vmem:[#allocation7 + $0x80] ss:$12 sps:$4 sm:$0xff]   ;;  %v2035_v17 = vld [vmem:[#allocation7 + $0x68] ss:$12 sps:$4 sm:$0xff]  }
  0x5f   : > { %1803 = vmatpush3.bf16.msra.mxu1 %v2022_v9  ;;  %v2016_v16 = vld [vmem:[#allocation7 + $0x34] ss:$12 sps:$4 sm:$0xff]   ;;  %v2018_v18 = vld [vmem:[#allocation7 + $0x30] ss:$12 sps:$4 sm:$0xff]   ;;  %v2021_v21 = vld [vmem:[#allocation7 + $0x18] ss:$12 sps:$4 sm:$0xff]   ;;  %v393_v9 = vlaneseq }
  0x60   : > { %1804 = vmatprep.subr.bf16.mxu1 %v2026_v12  ;;  %v2019_v19 = vld [vmem:[#allocation7 + $0x1c] ss:$12 sps:$4 sm:$0xff]   ;;  %v2023_v22 = vld [vmem:[#allocation7 + $0x4] ss:$12 sps:$4 sm:$0xff]   ;;  %v2025_v24 = vld [vmem:[#allocation7] ss:$12 sps:$4 sm:$0xff]  }
  0x61   : > { %563 = vmatpush1.bf16.msra.mxu0 %v2006_v5  ;;  %v2040_v20 = vld [vmem:[#allocation7 + $0x50] ss:$12 sps:$4 sm:$0xff]   ;;  %v2044_v23 = vld [vmem:[#allocation7 + $0x38] ss:$12 sps:$4 sm:$0xff]   ;;  %v2049_v26 = vld [vmem:[#allocation7 + $0x20] ss:$12 sps:$4 sm:$0xff]  }
  0x62   : > { %564 = vmatprep.subr.bf16.mxu0 %v2007_v6  ;;  %v2508_v25 = vld [vmem:[#allocation9 + $0xac] ss:$12 sps:$4 sm:$0xff]   ;;  %v2510_v27 = vld [vmem:[#allocation9 + $0xa8] ss:$12 sps:$4 sm:$0xff]   ;;  %v2516_v30 = vld [vmem:[#allocation9 + $0x90] ss:$12 sps:$4 sm:$0xff]  }
  0x63   : > { %1805 = vmatpush3.bf16.msra.mxu1 %v2026_v12  ;;  %v2513_v28 = vld [vmem:[#allocation9 + $0x94] ss:$12 sps:$4 sm:$0xff]   ;;  %v2520_v31 = vld [vmem:[#allocation9 + $0x7c] ss:$12 sps:$4 sm:$0xff]   ;;  %s2523_s29 = sshll.u32 %s2305_s24, 2  ;;  %v2944_v37 = vmov 0.0  }
  0x64   : > { %1806 = vmatprep.subr.bf16.mxu1 %v2031_v15  ;;  %v2053_v29 = vld [vmem:[#allocation7 + $0x8] ss:$12 sps:$4 sm:$0xff]   ;;  %v2527_v33 = vld [vmem:[#allocation9 + $0x78] ss:$12 sps:$4 sm:$0xff]   ;;  %v1027_v35 = vstv %s2523_s29  ;;  %v2533_v36 = vld [vmem:[#allocation9 + $0xb0] ss:$12 sps:$4 sm:$0xff]  }
  0x65   : > { %565 = vmatpush1.bf16.msra.mxu0 %v2009_v7  ;;  %v2036_v32 = vld [vmem:[%s2490_s27 + $0x8] sm:$0xff]   ;;  %v2530_v34 = vld [vmem:[#allocation9 + $0x64] ss:$12 sps:$4 sm:$0xff]   ;;  %v2557_v44 = vld [vmem:[%s2932_s0 + $0x8] sm:$0xff]  ;;  %s1335_s13 = sadd.s32 2, %s2523_s29  ;;  %s1490_s11 = sadd.s32 3, %s2523_s29 }
  0x66   : > { %566 = vmatprep.subr.bf16.mxu0 %v2010_v8  ;;  %v2539_v38 = vld [vmem:[%s2932_s0] sm:$0xff]  ;;  %v2542_v39 = vld [vmem:[#allocation9 + $0x60] ss:$12 sps:$4 sm:$0xff]   ;;  %v2552_v43 = vld [vmem:[#allocation9 + $0x98] ss:$12 sps:$4 sm:$0xff]   ;;  %vm1029_vm1 = vcmp.lt.s32.totalorder %v1027_v35, %v2557_v44  ;;  %v2578_v51 = vstv %s1335_s13  ;;  %vm2325_vm2 = vmmov 0   ;;  %v2595_v55 = vstv %s1490_s11 }
  0x67   : > { %1807 = vmatpush3.bf16.msra.mxu1 %v2031_v15  ;;  %v2045_v40 = vld [vmem:[%s2490_s27 + $0x10] sm:$0xff]   ;;  %vm1028_vm0 = vcmp.lt.s32.totalorder %v1027_v35, %v2539_v38  ;;  %v2548_v41 = vld [vmem:[#allocation9 + $0x4c] ss:$12 sps:$4 sm:$0xff]   ;;  %v1031_v50 = vsel %vm1029_vm1, 1, %v2942_v3  ;;  %v2581_v52 = vld [vmem:[#allocation9 + $0x1c] ss:$12 sps:$4 sm:$0xff]   ;;  %vm1337_vm3 = vcmp.lt.s32.totalorder %v2578_v51, %v2539_v38  ;;  %vm1492_vm4 = vcmp.lt.s32.totalorder %v2595_v55, %v2539_v38 }
  0x68   : > { %1808 = vmatprep.subr.bf16.mxu1 %v2035_v17  ;;  %v1030_v42 = vsel %vm1028_vm0, 1, %v2942_v3  ;;  %v2561_v45 = vld [vmem:[#allocation9 + $0x48] ss:$12 sps:$4 sm:$0xff]   ;;  %v2569_v47 = vld [vmem:[#allocation9 + $0x80] ss:$12 sps:$4 sm:$0xff]   ;;  %v2054_v48 = vld [vmem:[%s2490_s27 + $0x18] sm:$0xff]   ;;  %vm1338_vm7 = vcmp.lt.s32.totalorder %v2578_v51, %v2557_v44  ;;  %vm1493_vm8 = vcmp.lt.s32.totalorder %v2595_v55, %v2557_v44 }
  0x69   : > { %567 = vmatpush1.bf16.msra.mxu0 %v2012_v10  ;;  %1033 = vperm.xlu0 %1999, %v1030_v42   ;;  %v2564_v46 = vld [vmem:[#allocation9 + $0x34] ss:$12 sps:$4 sm:$0xff]   ;;  %v2574_v49 = vld [vmem:[#allocation9 + $0x30] ss:$12 sps:$4 sm:$0xff]   ;;  %v2593_v54 = vld [vmem:[#allocation9 + $0x18] ss:$12 sps:$4 sm:$0xff]  }
  0x6a   : > { %568 = vmatprep.subr.bf16.mxu0 %v2013_v11  ;;  %v2585_v53 = vld [vmem:[#allocation9 + $0x68] ss:$12 sps:$4 sm:$0xff]   ;;  %v2598_v56 = vld [vmem:[#allocation9 + $0x4] ss:$12 sps:$4 sm:$0xff]   ;;  %v1339_v58 = vsel %vm1337_vm3, 1, %v2942_v3  ;;  %v2613_v61 = vld [vmem:[#allocation2 + $0x8] sm:$0xff] }
  0x6b   : > { %1809 = vmatpush3.bf16.msra.mxu1 %v2035_v17  ;;  %v2601_v57 = vld [vmem:[#allocation9 + $0x50] ss:$12 sps:$4 sm:$0xff]   ;;  %v2608_v59 = vld [vmem:[#allocation9] ss:$12 sps:$4 sm:$0xff]   ;;  %v2617_v62 = vld [vmem:[#allocation9 + $0x38] ss:$12 sps:$4 sm:$0xff]  }
  0x6c   : > { %1810 = vmatprep.subr.bf16.mxu1 %v2040_v20  ;;  %v2611_v60 = vld [vmem:[#allocation2] sm:$0xff]  ;;  %v1494_v63 = vsel %vm1492_vm4, 1, %v2942_v3  ;;  %v2626_v1 = vld [vmem:[#allocation9 + $0x20] ss:$12 sps:$4 sm:$0xff]   ;;  %s1180_s16 = sadd.s32 1, %s2523_s29  ;;  %v1340_v7 = vsel %vm1338_vm7, 1, %v2942_v3 }
  0x6d   : > { %569 = vmatpush1.bf16.msra.mxu0 %v2015_v14  ;;  %1036 = vperm.xlu0 %1999, %v1031_v50   ;;  %v772_v0 = vpack.c.bf16 %v2613_v61, %v2611_v60  ;;  %v2633_v2 = vld [vmem:[#allocation9 + $0x8] ss:$12 sps:$4 sm:$0xff]   ;;  %v1181_v4 = vstv %s1180_s16  ;;  %v1495_v8 = vsel %vm1493_vm8, 1, %v2942_v3  ;;  %v394_v10 = vshrl.u32 %v393_v9, 7  ;;  %v391_v15 = vld [vmem:[%s2935_s3] sm:$0x7] }
  0x6e   : > { %570 = vmatprep.subr.bf16.mxu0 %v2016_v16  ;;  %vm1182_vm5 = vcmp.lt.s32.totalorder %v1181_v4, %v2539_v38  ;;  %vm1183_vm6 = vcmp.lt.s32.totalorder %v1181_v4, %v2557_v44  ;;  %s1753_s27 = sshll.u32 %s2305_s24, 10  ;;  %s1530_s2 = sshll.u32 %s2501_s9, 4  ;;  %s2882_s2 = int_to_ptr.vmem [resolvable:$true] %s1530_s2 }
  0x6f   : > { %1811 = vmatpush3.bf16.msra.mxu1 %v2040_v20  ;;  %v1184_v5 = vsel %vm1182_vm5, 1, %v2942_v3  ;;  %v1185_v6 = vsel %vm1183_vm6, 1, %v2942_v3  ;;  %v403_v14 = vsub.s32 2, %v394_v10  ;;  %v399_v17 = vsub.s32 1, %v394_v10  ;;  %s2880_s20 = scalar_lea.hbm %s2938_s6, %s1753_s27  ;;  %s1514_s24 = scalar_lea.sflag [#allocation6], %s2486_s15 }
  0x70   : > { %1812 = vmatprep.subr.bf16.mxu1 %v2044_v23  ;;  %1187 = vperm.xlu1 %2000, %v1184_v5   ;;  %s2229_s28 = scalar_lea.vmem %s2882_s2, 1024  ;;  %s2326_s30 = smov [#allocation10]  }
  0x71   : > { %571 = vmatpush1.bf16.msra.mxu0 %v2018_v18  ;;  %1342 = vperm.xlu0 %1999, %v1339_v58   ;;  %v2684_v20 = vrot.slane %v391_v15, %v403_v14  ;;  %p2230_p9 = scmp.ne.s32.totalorder %s2882_s2, %s2229_s28  ;;  %s2233_s13 = sshll.u32 %s2326_s30, 4  ;;  %s2234_s13 = int_to_ptr.vmem [resolvable:$false] %s2233_s13 }
  0x72   : > { %572 = vmatprep.subr.bf16.mxu0 %v2019_v19  ;;  %s2235_s11 = scalar_lea.vmem %s2234_s13, 2048  ;;  %p2236_p13 = scmp.lt.s32.totalorder %s2882_s2, %s2234_s13 }
  0x73   : > { %1813 = vmatpush3.bf16.msra.mxu1 %v2044_v23  ;;  %p2231_p11 = pnand %p2230_p9, %p2459_p7  ;;  %p2237_p0 = scmp.lt.s32.totalorder %s2235_s11, %s2229_s28 }
  0x74   : > { %1814 = vmatprep.subr.bf16.mxu1 %v2049_v26  ;;  %1190 = vperm.xlu1 %2000, %v1185_v6  }
  0x75   : > { %573 = vmatpush1.bf16.msra.mxu0 %v2021_v21  ;;  %1497 = vperm.xlu0 %1999, %v1494_v63   ;;  %p2232_p2 = pneg %p2231_p11  ;;  %p2238_p5 = por %p2237_p0, %p2236_p13 }
  0x76   : > { %574 = vmatprep.subr.bf16.mxu0 %v2023_v22  ;;  %v400_v22 = vrot.slane %v391_v15, %v399_v17 }
  0x77   : > { %1815 = vmatpush3.bf16.msra.mxu1 %v2049_v26  ;;  %p2239_p10 = pnand %p2238_p5, %p2232_p2 }
  0x78   : > { %1816 = vmatprep.subr.bf16.mxu1 %v2053_v29  ;;  %1345 = vperm.xlu1 %2000, %v1340_v7  }
  0x79   : > { %575 = vmatpush1.bf16.msra.mxu0 %v2025_v24 }
  0x7a   : > { %901 = vmatprep.subr.bf16.mxu0 %v2508_v25 }
  0x7b   : > { %1817 = vmatpush3.bf16.msra.mxu1 %v2053_v29 }
  0x7c   : > { %593 = vmatmul.mubr.bf16.vlgmr.msra.gmra.mxu0 %v2027_v13  ;;  %1826 = vmatprep.subr.bf16.mxu1 %v2944_v37  ;;  %v395_v13 = vsub.s32 0, %v394_v10 }
  0x7d   : > { %902 = vmatpush1.bf16.msra.mxu0 %v2510_v27  ;;  %602 = vmatprep.mubr.bf16.mxu0 %v2942_v3 }
  0x7e   : > { %903 = vmatprep.subr.bf16.mxu0 %v2513_v28  ;;  %1819 = vmatmul.mubr.bf16.vlgmr.msra.gmra.mxu1 %v2036_v32  ;;  %v396_v19 = vrot.slane %v391_v15, %v395_v13 }
  0x7f   : > { %1827 = vmatpush3.bf16.msra.mxu1 %v2533_v36  ;;  %1822 = vmatprep.mubr.bf16.mxu1 %v2045_v40 }
  0x80   : > { %1828 = vmatprep.subr.bf16.mxu1 %v2944_v37  ;;  %1500 = vperm.xlu1 %2000, %v1495_v8  }
  0x81   : > { %904 = vmatpush1.bf16.msra.mxu0 %v2516_v30 }
  0x82   : > { %905 = vmatprep.subr.bf16.mxu0 %v2520_v31 }
  0x83   : > { %1829 = vmatpush3.bf16.msra.mxu1 %v2552_v43 }
  0x84   : > { %603 = vmatmul.mubr.bf16.gmra.mxu0 %v2036_v32  ;;  %1830 = vmatprep.subr.bf16.mxu1 %v2944_v37 }
  0x85   : > { %906 = vmatpush1.bf16.msra.mxu0 %v2527_v33  ;;  %612 = vmatprep.mubr.bf16.mxu0 %v2942_v3 }
  0x86   : > { %907 = vmatprep.subr.bf16.mxu0 %v2530_v34  ;;  %1823 = vmatmul.mubr.bf16.gmra.mxu1 %v2054_v48 }
  0x87   : > { %1831 = vmatpush3.bf16.msra.mxu1 %v2569_v47  ;;  %1842 = vmatprep.mubr.msk.bf16.mxu1 %vm2325_vm2, %v2944_v37 }
  0x88   : > { %1832 = vmatprep.subr.bf16.mxu1 %v2944_v37 }
  0x89   : > { %908 = vmatpush1.bf16.msra.mxu0 %v2542_v39 }
  0x8a   : > { %909 = vmatprep.subr.bf16.mxu0 %v2548_v41 }
  0x8b   : > { %1833 = vmatpush3.bf16.msra.mxu1 %v2585_v53 }
  0x8c   : > { %613 = vmatmul.mubr.bf16.gmra.mxu0 %v2045_v40  ;;  %1834 = vmatprep.subr.bf16.mxu1 %v2944_v37 }
  0x8d   : > { %910 = vmatpush1.bf16.msra.mxu0 %v2561_v45  ;;  %622 = vmatprep.mubr.bf16.mxu0 %v2942_v3 }
  0x8e   : > { %911 = vmatprep.subr.bf16.mxu0 %v2564_v46 }
  0x8f   : > { %1835 = vmatpush3.bf16.msra.mxu1 %v2601_v57 }
  0x90   : > { %1836 = vmatprep.subr.bf16.mxu1 %v2944_v37 }
  0x91   : > { %912 = vmatpush1.bf16.msra.mxu0 %v2574_v49 }
  0x92   : > { %913 = vmatprep.subr.bf16.mxu0 %v2581_v52 }
  0x93   : > { %1837 = vmatpush3.bf16.msra.mxu1 %v2617_v62 }
  0x94   : > { %623 = vmatmul.mubr.bf16.gmra.mxu0 %v2054_v48  ;;  %1838 = vmatprep.subr.bf16.mxu1 %v2944_v37 }
  0x95   : > { %914 = vmatpush1.bf16.msra.mxu0 %v2593_v54  ;;  %933 = vmatprep.mubr.bf16.mxu0 %v2942_v3 }
  0x96   : > { %915 = vmatprep.subr.bf16.mxu0 %v2598_v56 }
  0x97   : > { %1839 = vmatpush3.bf16.msra.mxu1 %v2626_v1 }
  0x98   : > { %1840 = vmatprep.subr.bf16.mxu1 %v2944_v37 }
  0x99   : > { %916 = vmatpush1.bf16.msra.mxu0 %v2608_v59 }
  0x9a   : > { %1054 = vmatprep.subr.bf16.mxu0 %v2508_v25 }
  0x9b   : > { %1841 = vmatpush3.bf16.msra.mxu1 %v2633_v2 }
  0x9c   : > { %934 = vmatmul.mubr.bf16.vlgmr.msra.gmra.mxu0 %v772_v0  ;;  %1846 = vmatprep.subr.bf16.mxu1 %v2944_v37 }
  0x9d   : > { %1055 = vmatpush1.bf16.msra.mxu0 %v2510_v27  ;;  %1086 = vmatprep.mubr.bf16.mxu0 %v2942_v3 }
  0x9e   : > { %1056 = vmatprep.subr.bf16.mxu0 %v2513_v28  ;;  %1843 = vmatmul.mubr.bf16.vlgmr.msra.gmra.mxu1 %v772_v0 }
  0x9f   : > { %1847 = vmatpush3.bf16.msra.mxu1 %v2533_v36  ;;  %1862 = vmatprep.mubr.msk.bf16.mxu1 %vm2325_vm2, %v2944_v37 }
  0xa0   : > { %1848 = vmatprep.subr.bf16.mxu1 %v2944_v37 }
  0xa1   : > { %1057 = vmatpush1.bf16.msra.mxu0 %v2516_v30 }
  0xa2   : > { %1058 = vmatprep.subr.bf16.mxu0 %v2520_v31 }
  0xa3   : > { %1849 = vmatpush3.bf16.msra.mxu1 %v2552_v43 }
  0xa4   : > { %1850 = vmatprep.subr.bf16.mxu1 %v2944_v37 }
  0xa5   : > { %1059 = vmatpush1.bf16.msra.mxu0 %v2527_v33 }
  0xa6   : > { %1060 = vmatprep.subr.bf16.mxu0 %v2530_v34 }
  0xa7   : > { %1851 = vmatpush3.bf16.msra.mxu1 %v2569_v47 }
  0xa8   : > { %1852 = vmatprep.subr.bf16.mxu1 %v2944_v37 }
  0xa9   : > { %1061 = vmatpush1.bf16.msra.mxu0 %v2542_v39 }
  0xaa   : > { %1062 = vmatprep.subr.bf16.mxu0 %v2548_v41 }
  0xab   : > { %1853 = vmatpush3.bf16.msra.mxu1 %v2585_v53 }
  0xac   : > { %1854 = vmatprep.subr.bf16.mxu1 %v2944_v37 }
  0xad   : > { %1063 = vmatpush1.bf16.msra.mxu0 %v2561_v45 }
  0xae   : > { %1064 = vmatprep.subr.bf16.mxu0 %v2564_v46 }
  0xaf   : > { %1855 = vmatpush3.bf16.msra.mxu1 %v2601_v57 }
  0xb0   : > { %1856 = vmatprep.subr.bf16.mxu1 %v2944_v37 }
  0xb1   : > { %1065 = vmatpush1.bf16.msra.mxu0 %v2574_v49 }
  0xb2   : > { %1066 = vmatprep.subr.bf16.mxu0 %v2581_v52 }
  0xb3   : > { %1857 = vmatpush3.bf16.msra.mxu1 %v2617_v62 }
  0xb4   : > { %1858 = vmatprep.subr.bf16.mxu1 %v2944_v37 }
  0xb5   : > { %1067 = vmatpush1.bf16.msra.mxu0 %v2593_v54 }
  0xb6   : > { %1068 = vmatprep.subr.bf16.mxu0 %v2598_v56 }
  0xb7   : > { %1859 = vmatpush3.bf16.msra.mxu1 %v2626_v1 }
  0xb8   : > { %1860 = vmatprep.subr.bf16.mxu1 %v2944_v37 }
  0xb9   : > { %1069 = vmatpush1.bf16.msra.mxu0 %v2608_v59 }
  0xba   : > { %1209 = vmatprep.subr.bf16.mxu0 %v2508_v25 }
  0xbb   : > { %1861 = vmatpush3.bf16.msra.mxu1 %v2633_v2 }
  0xbc   : > { %1866 = vmatprep.subr.bf16.mxu1 %v2944_v37 }
 0x13c   : > { %v594_v11 = vpop.f32.mrf.mxu0 }
 0x13e   : > { %v596_v12 = vpop.f32.mrf.mxu0  ;;  %v1820_v26 = vpop.f32.mrf.mxu1 }
 0x13f   : > { %v2691_v32 = vadd.f32 %v1820_v26, %v2684_v20 }
 0x140   : > { %v598_v16 = vpop.f32.mrf.mxu0  ;;  %v2693_v38 = vpop.f32.mrf.mxu1 }
 0x141   : > { %v599_v3 = vadd.f32 %v598_v16, %v396_v19 }
 0x142   : > { %v600_v18 = vpop.f32.mrf.mxu0  ;;  %v1821_v44 = vpop.f32.mrf.mxu1 }
 0x143   : > { %v2700_v50 = vadd.f32 %v1821_v44, %v2684_v20 }
 0x144   : > { %v604_v21 = vpop.f32.mrf.mxu0  ;;  %v2702_v55 = vpop.f32.mrf.mxu1 }
 0x145   : > { %v2686_v23 = vadd.f32 %v604_v21, %v396_v19 }
 0x146   : > { %v606_v24 = vpop.f32.mrf.mxu0  ;;  %v1824_v0 = vpop.f32.mrf.mxu1 }
 0x147   : > { %v2688_v29 = vadd.f32 %v606_v24, %v400_v22  ;;  %v2709_v5 = vadd.f32 %v1824_v0, %v2684_v20  ;;  %v595_v0 = vadd.f32 %v594_v11, %v396_v19 }
 0x148   : > { %v608_v35 = vpop.f32.mrf.mxu0  ;;  %v683_v7 = vpop.f32.mrf.mxu1 }
 0x149   : > { %v2695_v40 = vadd.f32 %v608_v35, %v396_v19  ;;  %2960 = vst [vmem:[#allocation14_spill] sm:$0xff] %v2709_v5  ;;  %v2714_v9 = vadd.f32 %v683_v7, %v2684_v20  ;;  %v597_v5 = vadd.f32 %v596_v12, %v400_v22 }
 0x14a   : > { %v610_v42 = vpop.f32.mrf.mxu0  ;;  %v1825_v13 = vpop.f32.mrf.mxu1 }
 0x14b   : > { %v2697_v48 = vadd.f32 %v610_v42, %v400_v22  ;;  %2961 = vst [vmem:[#allocation15_spill] sm:$0xff] %v2714_v9  ;;  %v2719_v15 = vadd.f32 %v1825_v13, %v2684_v20 }
 0x14c   : > { %v614_v51 = vpop.f32.mrf.mxu0  ;;  %v686_v21 = vpop.f32.mrf.mxu1 }
 0x14d   : > { %v2704_v58 = vadd.f32 %v614_v51, %v396_v19  ;;  %2962 = vst [vmem:[#allocation16_spill] sm:$0xff] %v2719_v15  ;;  %v2724_v26 = vadd.f32 %v686_v21, %v2684_v20 }
 0x14e   : > { %v616_v63 = vpop.f32.mrf.mxu0 }
 0x14f   : > { %v2706_v4 = vadd.f32 %v616_v63, %v400_v22  ;;  %2964 = vst [vmem:[#allocation18_spill] sm:$0xff] %v2724_v26 }
 0x150   : > { %v618_v6 = vpop.f32.mrf.mxu0 }
 0x151   : > { %v2711_v8 = vadd.f32 %v618_v6, %v396_v19 }
 0x152   : > { %v620_v10 = vpop.f32.mrf.mxu0 }
 0x153   : > { %v2716_v14 = vadd.f32 %v620_v10, %v400_v22 }
 0x154   : > { %v624_v17 = vpop.f32.mrf.mxu0 }
 0x155   : > { %v2721_v24 = vadd.f32 %v624_v17, %v396_v19 }
 0x156   : > { %v626_v35 = vpop.f32.mrf.mxu0 }
 0x157   : > { %2963 = vst [vmem:[#allocation17_spill] sm:$0xff] %v2721_v24  ;;  %v2726_v42 = vadd.f32 %v626_v35, %v400_v22 }
 0x158   : > { %v628_v44 = vpop.f32.mrf.mxu0 }
 0x159   : > { %2965 = vst [vmem:[#allocation19_spill] sm:$0xff] %v2726_v42  ;;  %v2728_v51 = vadd.f32 %v628_v44, %v396_v19 }
 0x15a   : > { %v630_v63 = vpop.f32.mrf.mxu0 }
 0x15b   : > { %2966 = vst [vmem:[#allocation20_spill] sm:$0xff] %v2728_v51  ;;  %v2730_v6 = vadd.f32 %v630_v63, %v400_v22  ;;  %v601_v51 = vadd.f32 %v600_v18, %v400_v22 }
 0x15c   : > { %v935_v7 = vpop.f32.mrf.mxu0 }
 0x15d   : > { %2967 = vst [vmem:[#allocation21_spill] sm:$0xff] %v2730_v6  ;;  %v985_v10 = vadd.f32 %v935_v7, %v595_v0  ;;  %v671_v7 = vadd.f32 %v2702_v55, %v2684_v20 }
 0x15e   : > { %v937_v13 = vpop.f32.mrf.mxu0  ;;  %v978_v35 = vpop.f32.mrf.mxu1 }
 0x15f   : > { %v1722_v37 = vmul.f32 -1.442695, %v985_v10  ;;  %v999_v42 = vadd.f32 %v937_v13, %v597_v5  ;;  %v668_v5 = vadd.f32 %v2693_v38, %v2684_v20 }
 0x160   : > { %v939_v17 = vpop.f32.mrf.mxu0  ;;  %v1844_v24 = vpop.f32.mrf.mxu1 }
 0x161   : > { %2069 = vpow2.f32 %v1722_v37  ;;  %v986_v15 = vadd.f32 %v939_v17, %v599_v3  ;;  %v1724_v11 = vmul.f32 -1.442695, %v999_v42  ;;  %v2735_v3 = vld [vmem:[%s2937_s5] ss:$0 sm:$0xff] }
 0x162   : > { %v941_v44 = vpop.f32.mrf.mxu0  ;;  %v981_v26 = vpop.f32.mrf.mxu1  ;;  %v1013_v12 = vadd.f32 %v2735_v3, %v978_v35 }
 0x163   : > { %v1723_v21 = vmul.f32 -1.442695, %v986_v15  ;;  %v1000_v63 = vadd.f32 %v941_v44, %v601_v51  ;;  %v1014_v51 = vadd.f32 %v2735_v3, %v981_v26  ;;  %v1034_v44 = vpop.permute.xlu0 %1033 }
 0x164   : > { %v1845_v6 = vpop.f32.mrf.mxu1  ;;  %vm1038_vm9 = vcmp.eq.s32.totalorder %v1034_v44, 1 }
 0x165   : > { %2071 = vpow2.f32 %v1723_v21  ;;  %v1725_v16 = vmul.f32 -1.442695, %v1000_v63 }
 0x166   : > { %2073 = vpow2.f32 %v1724_v11 }
 0x16e   : > { %v2070_v9 = vpop.eup %2069 }
 0x16f   : > { %v993_v0 = vadd.f32 1.0, %v2070_v9 }
 0x171   : > { %2075 = vrcp.f32 %v993_v0 }
 0x172   : > { %v2072_v19 = vpop.eup %2071  ;;  %2077 = vpow2.f32 %v1725_v16 }
 0x173   : > { %v994_v37 = vadd.f32 1.0, %v2072_v19  ;;  %v2074_v18 = vpop.eup %2073  ;;  %v1037_v19 = vpop.permute.xlu0 %1036 }
 0x174   : > { %v1007_v24 = vadd.f32 1.0, %v2074_v18  ;;  %vm1039_vm10 = vcmp.eq.s32.totalorder %v1037_v19, 1 }
 0x175   : > { %2079 = vrcp.f32 %v994_v37 }
 0x17e   : > { %v2076_v22 = vpop.eup %2075 }
 0x17f   : > { %v1015_v9 = vmul.f32 %v2076_v22, %v1013_v12  ;;  %v2078_v15 = vpop.eup %2077 }
 0x180   : > { %v1008_v13 = vadd.f32 1.0, %v2078_v15 }
 0x181   : > { %v1017_v42 = vadd.f32 %v1015_v9, %v668_v5  ;;  %v2968_v9 = vmov 0.0  }
 0x182   : > { %v2080_v6 = vpop.eup %2079 }
 0x183   : > { %2081 = vtanh.f32 %v1017_v42  ;;  %v1016_v10 = vmul.f32 %v2080_v6, %v1014_v51 }
 0x184   : > { %2083 = vrcp.f32 %v1007_v24 }
 0x185   : > { %v1018_v17 = vadd.f32 %v1016_v10, %v671_v7 }
 0x187   : > { %2085 = vtanh.f32 %v1018_v17 }
 0x188   : > { %2087 = vrcp.f32 %v1008_v13 }
 0x190   : > { %v2082_v21 = vpop.eup %2081 }
 0x191   : > { %v1021_v38 = vsub.f32 %v2611_v60, %v2082_v21  ;;  %v2084_v35 = vpop.eup %2083 }
 0x193   : > { %v1023_v11 = vmul.f32 %v2084_v35, %v1021_v38 }
 0x194   : > { %v2086_v26 = vpop.eup %2085 }
 0x195   : > { %v1025_v63 = vadd.f32 %v2082_v21, %v1023_v11  ;;  %v1022_v20 = vsub.f32 %v2613_v61, %v2086_v26  ;;  %v2088_v55 = vpop.eup %2087 }
 0x197   : > { %v1040_v0 = vsel %vm1038_vm9, %v1025_v63, 0.0  ;;  %v1024_v16 = vmul.f32 %v2088_v55, %v1022_v20  ;;  %v2747_v12 = vsel %vm1038_vm9, %v1025_v63, %v2611_v60  ;;  %v2969_v60 = vmov 0  }
 0x198   : > { %1042 = vst [vmem:[%s2501_s9] sm:$0xff] %v1040_v0 }
 0x199   : > { %v1026_v37 = vadd.f32 %v2086_v26, %v1024_v16 }
 0x19b   : > { %v1041_v18 = vsel %vm1039_vm10, %v1026_v37, 0.0  ;;  %v2750_v22 = vsel %vm1039_vm10, %v1026_v37, %v2613_v61 }
 0x19c   : > { %1043 = vst [vmem:[%s2501_s9 + $0x8] sm:$0xff] %v1041_v18  ;;  %v1053_v5 = vpack.c.bf16 %v2750_v22, %v2747_v12 }
 0x19e   : > { %1087 = vmatmul.mubr.bf16.vlgmr.msra.gmra.mxu0 %v1053_v5  ;;  %1863 = vmatmul.mubr.bf16.vlgmr.msra.gmra.mxu1 %v1053_v5 }
 0x19f   : > { %1210 = vmatpush1.bf16.msra.mxu0 %v2510_v27  ;;  %1867 = vmatpush3.bf16.msra.mxu1 %v2533_v36 }
 0x1a0   : > { %1211 = vmatprep.subr.bf16.mxu0 %v2513_v28  ;;  %1868 = vmatprep.subr.bf16.mxu1 %v2968_v9 }
 0x1a1   : > { %1241 = vmatprep.mubr.bf16.mxu0 %v2969_v60  ;;  %1882 = vmatprep.mubr.msk.bf16.mxu1 %vm2325_vm2, %v2968_v9 }
 0x1a3   : > { %1212 = vmatpush1.bf16.msra.mxu0 %v2516_v30  ;;  %1869 = vmatpush3.bf16.msra.mxu1 %v2552_v43 }
 0x1a4   : > { %1213 = vmatprep.subr.bf16.mxu0 %v2520_v31  ;;  %1870 = vmatprep.subr.bf16.mxu1 %v2968_v9 }
 0x1a7   : > { %1214 = vmatpush1.bf16.msra.mxu0 %v2527_v33  ;;  %1871 = vmatpush3.bf16.msra.mxu1 %v2569_v47 }
 0x1a8   : > { %1215 = vmatprep.subr.bf16.mxu0 %v2530_v34  ;;  %1872 = vmatprep.subr.bf16.mxu1 %v2968_v9 }
 0x1ab   : > { %1216 = vmatpush1.bf16.msra.mxu0 %v2542_v39  ;;  %1873 = vmatpush3.bf16.msra.mxu1 %v2585_v53 }
 0x1ac   : > { %1217 = vmatprep.subr.bf16.mxu0 %v2548_v41  ;;  %1874 = vmatprep.subr.bf16.mxu1 %v2968_v9 }
 0x1af   : > { %1218 = vmatpush1.bf16.msra.mxu0 %v2561_v45  ;;  %1875 = vmatpush3.bf16.msra.mxu1 %v2601_v57 }
 0x1b0   : > { %1219 = vmatprep.subr.bf16.mxu0 %v2564_v46  ;;  %1876 = vmatprep.subr.bf16.mxu1 %v2968_v9 }
 0x1b3   : > { %1220 = vmatpush1.bf16.msra.mxu0 %v2574_v49  ;;  %1877 = vmatpush3.bf16.msra.mxu1 %v2617_v62 }
 0x1b4   : > { %1221 = vmatprep.subr.bf16.mxu0 %v2581_v52  ;;  %1878 = vmatprep.subr.bf16.mxu1 %v2968_v9 }
 0x1b7   : > { %1222 = vmatpush1.bf16.msra.mxu0 %v2593_v54  ;;  %1879 = vmatpush3.bf16.msra.mxu1 %v2626_v1 }
 0x1b8   : > { %1223 = vmatprep.subr.bf16.mxu0 %v2598_v56  ;;  %1880 = vmatprep.subr.bf16.mxu1 %v2968_v9 }
 0x1bb   : > { %1224 = vmatpush1.bf16.msra.mxu0 %v2608_v59  ;;  %1881 = vmatpush3.bf16.msra.mxu1 %v2633_v2 }
 0x1bc   : > { %1364 = vmatprep.subr.bf16.mxu0 %v2508_v25  ;;  %1886 = vmatprep.subr.bf16.mxu1 %v2968_v9 }
 0x25e   : > { %v1088_v61 = vpop.f32.mrf.mxu0  ;;  %v1131_v15 = vpop.f32.mrf.mxu1 }
 0x25f   : > { %v1138_v24 = vadd.f32 %v1088_v61, %v2686_v23 }
 0x260   : > { %v1090_v42 = vpop.f32.mrf.mxu0  ;;  %v1864_v51 = vpop.f32.mrf.mxu1 }
 0x261   : > { %v1726_v6 = vmul.f32 -1.442695, %v1138_v24  ;;  %v1152_v38 = vadd.f32 %v1090_v42, %v2688_v29 }
 0x262   : > { %v1092_v7 = vpop.f32.mrf.mxu0  ;;  %v1134_v10 = vpop.f32.mrf.mxu1 }
 0x263   : > { %2089 = vpow2.f32 %v1726_v6  ;;  %v1139_v13 = vadd.f32 %v1092_v7, %v2695_v40  ;;  %v1728_v35 = vmul.f32 -1.442695, %v1152_v38  ;;  %v1166_v40 = vadd.f32 %v2735_v3, %v1131_v15  ;;  %v1188_v6 = vpop.permute.xlu1 %1187 }
 0x264   : > { %v1865_v17 = vpop.f32.mrf.mxu1  ;;  %v1094_v25 = vpop.f32.mrf.mxu0  ;;  %vm1192_vm11 = vcmp.eq.s32.totalorder %v1188_v6, 1 }
 0x265   : > { %v1727_v21 = vmul.f32 -1.442695, %v1139_v13  ;;  %v1153_v44 = vadd.f32 %v1094_v25, %v2697_v48  ;;  %v1167_v48 = vadd.f32 %v2735_v3, %v1134_v10 }
 0x267   : > { %2091 = vpow2.f32 %v1727_v21  ;;  %v1729_v23 = vmul.f32 -1.442695, %v1153_v44 }
 0x268   : > { %2093 = vpow2.f32 %v1728_v35 }
 0x270   : > { %v2090_v11 = vpop.eup %2089 }
 0x271   : > { %v1146_v26 = vadd.f32 1.0, %v2090_v11 }
 0x273   : > { %2095 = vrcp.f32 %v1146_v26 }
 0x274   : > { %v2092_v63 = vpop.eup %2091  ;;  %2097 = vpow2.f32 %v1729_v23  ;;  %v2971_v23 = vld [vmem:[#allocation18_spill] sm:$0xff] }
 0x275   : > { %v1147_v20 = vadd.f32 1.0, %v2092_v63  ;;  %v2094_v55 = vpop.eup %2093 }
 0x276   : > { %v1160_v37 = vadd.f32 1.0, %v2094_v55 }
 0x277   : > { %2099 = vrcp.f32 %v1147_v20 }
 0x280   : > { %v2096_v0 = vpop.eup %2095 }
 0x281   : > { %v1168_v16 = vmul.f32 %v2096_v0, %v1166_v40  ;;  %v2098_v19 = vpop.eup %2097 }
 0x282   : > { %v1161_v24 = vadd.f32 1.0, %v2098_v19 }
 0x283   : > { %v1170_v29 = vadd.f32 %v1168_v16, %v2691_v32 }
 0x284   : > { %v2100_v18 = vpop.eup %2099 }
 0x285   : > { %2101 = vtanh.f32 %v1170_v29  ;;  %v1169_v5 = vmul.f32 %v2100_v18, %v1167_v48  ;;  %v1343_v29 = vpop.permute.xlu0 %1342 }
 0x286   : > { %2103 = vrcp.f32 %v1160_v37  ;;  %vm1347_vm13 = vcmp.eq.s32.totalorder %v1343_v29, 1 }
 0x287   : > { %v1171_v61 = vadd.f32 %v1169_v5, %v2700_v50  ;;  %v1191_v50 = vpop.permute.xlu1 %1190 }
 0x288   : > { %vm1193_vm12 = vcmp.eq.s32.totalorder %v1191_v50, 1 }
 0x289   : > { %2105 = vtanh.f32 %v1171_v61 }
 0x28a   : > { %2107 = vrcp.f32 %v1161_v24 }
 0x28b   : > { %v1346_v24 = vpop.permute.xlu1 %1345 }
 0x28c   : > { %vm1348_vm14 = vcmp.eq.s32.totalorder %v1346_v24, 1 }
 0x292   : > { %v2102_v42 = vpop.eup %2101 }
 0x293   : > { %v1174_v15 = vsub.f32 %v2747_v12, %v2102_v42  ;;  %v2104_v51 = vpop.eup %2103 }
 0x295   : > { %v1176_v32 = vmul.f32 %v2104_v51, %v1174_v15 }
 0x296   : > { %v2106_v7 = vpop.eup %2105 }
 0x297   : > { %v1178_v10 = vadd.f32 %v2102_v42, %v1176_v32  ;;  %v1175_v13 = vsub.f32 %v2750_v22, %v2106_v7  ;;  %v2108_v17 = vpop.eup %2107 }
 0x299   : > { %v1194_v21 = vsel %vm1192_vm11, %v1178_v10, 0.0  ;;  %v1177_v38 = vmul.f32 %v2108_v17, %v1175_v13  ;;  %v2802_v35 = vsel %vm1192_vm11, %v1178_v10, %v2747_v12  ;;  %v2972_v13 = vld [vmem:[#allocation17_spill] sm:$0xff] }
 0x29a   : > { %1730 = vst [vmem:[%s2501_s9 + $0x10] sm:$0xff] %v1194_v21 }
 0x29b   : > { %v1179_v25 = vadd.f32 %v2106_v7, %v1177_v38 }
 0x29d   : > { %v1195_v44 = vsel %vm1193_vm12, %v1179_v25, 0.0  ;;  %v2805_v11 = vsel %vm1193_vm12, %v1179_v25, %v2750_v22 }
 0x29e   : > { %1731 = vst [vmem:[%s2501_s9 + $0x18] sm:$0xff] %v1195_v44  ;;  %v1208_v26 = vpack.c.bf16 %v2805_v11, %v2802_v35 }
 0x2a0   : > { %1242 = vmatmul.mubr.bf16.vlgmr.msra.gmra.mxu0 %v1208_v26  ;;  %1883 = vmatmul.mubr.bf16.vlgmr.msra.gmra.mxu1 %v1208_v26 }
 0x2a1   : > { %1365 = vmatpush1.bf16.msra.mxu0 %v2510_v27  ;;  %1887 = vmatpush3.bf16.msra.mxu1 %v2533_v36 }
 0x2a2   : > { %1366 = vmatprep.subr.bf16.mxu0 %v2513_v28  ;;  %1888 = vmatprep.subr.bf16.mxu1 %v2968_v9 }
 0x2a3   : > { %1396 = vmatprep.mubr.bf16.mxu0 %v2969_v60  ;;  %1902 = vmatprep.mubr.msk.bf16.mxu1 %vm2325_vm2, %v2968_v9 }
 0x2a5   : > { %1367 = vmatpush1.bf16.msra.mxu0 %v2516_v30  ;;  %1889 = vmatpush3.bf16.msra.mxu1 %v2552_v43 }
 0x2a6   : > { %1368 = vmatprep.subr.bf16.mxu0 %v2520_v31  ;;  %1890 = vmatprep.subr.bf16.mxu1 %v2968_v9 }
 0x2a9   : > { %1369 = vmatpush1.bf16.msra.mxu0 %v2527_v33  ;;  %1891 = vmatpush3.bf16.msra.mxu1 %v2569_v47 }
 0x2aa   : > { %1370 = vmatprep.subr.bf16.mxu0 %v2530_v34  ;;  %1892 = vmatprep.subr.bf16.mxu1 %v2968_v9 }
 0x2ad   : > { %1371 = vmatpush1.bf16.msra.mxu0 %v2542_v39  ;;  %1893 = vmatpush3.bf16.msra.mxu1 %v2585_v53 }
 0x2ae   : > { %1372 = vmatprep.subr.bf16.mxu0 %v2548_v41  ;;  %1894 = vmatprep.subr.bf16.mxu1 %v2968_v9 }
 0x2b1   : > { %1373 = vmatpush1.bf16.msra.mxu0 %v2561_v45  ;;  %1895 = vmatpush3.bf16.msra.mxu1 %v2601_v57 }
 0x2b2   : > { %1374 = vmatprep.subr.bf16.mxu0 %v2564_v46  ;;  %1896 = vmatprep.subr.bf16.mxu1 %v2968_v9 }
 0x2b5   : > { %1375 = vmatpush1.bf16.msra.mxu0 %v2574_v49  ;;  %1897 = vmatpush3.bf16.msra.mxu1 %v2617_v62 }
 0x2b6   : > { %1376 = vmatprep.subr.bf16.mxu0 %v2581_v52  ;;  %1898 = vmatprep.subr.bf16.mxu1 %v2968_v9 }
 0x2b9   : > { %1377 = vmatpush1.bf16.msra.mxu0 %v2593_v54  ;;  %1899 = vmatpush3.bf16.msra.mxu1 %v2626_v1 }
 0x2ba   : > { %1378 = vmatprep.subr.bf16.mxu0 %v2598_v56  ;;  %1900 = vmatprep.subr.bf16.mxu1 %v2968_v9 }
 0x2bd   : > { %1379 = vmatpush1.bf16.msra.mxu0 %v2608_v59  ;;  %1901 = vmatpush3.bf16.msra.mxu1 %v2633_v2 }
 0x360   : > { %v1243_v27 = vpop.f32.mrf.mxu0  ;;  %v1286_v28 = vpop.f32.mrf.mxu1 }
 0x361   : > { %v1293_v30 = vadd.f32 %v1243_v27, %v2704_v58  ;;  %v1321_v1 = vadd.f32 %v2735_v3, %v1286_v28  ;;  %v2974_v28 = vld [vmem:[#allocation19_spill] sm:$0xff] }
 0x362   : > { %v1245_v31 = vpop.f32.mrf.mxu0  ;;  %v1884_v33 = vpop.f32.mrf.mxu1 }
 0x363   : > { %v1732_v34 = vmul.f32 -1.442695, %v1293_v30  ;;  %v1307_v46 = vadd.f32 %v1245_v31, %v2706_v4  ;;  %v2970_v4 = vld [vmem:[#allocation15_spill] sm:$0xff] }
 0x364   : > { %v1247_v36 = vpop.f32.mrf.mxu0  ;;  %v1289_v39 = vpop.f32.mrf.mxu1 }
 0x365   : > { %2109 = vpow2.f32 %v1732_v34  ;;  %v1294_v41 = vadd.f32 %v1247_v36, %v2711_v8  ;;  %v1734_v49 = vmul.f32 -1.442695, %v1307_v46  ;;  %v2975_v34 = vld [vmem:[#allocation21_spill] sm:$0xff] }
 0x366   : > { %v1885_v43 = vpop.f32.mrf.mxu1  ;;  %v1249_v47 = vpop.f32.mrf.mxu0 }
 0x367   : > { %v1733_v45 = vmul.f32 -1.442695, %v1294_v41  ;;  %v1308_v52 = vadd.f32 %v1249_v47, %v2716_v14  ;;  %v1322_v14 = vadd.f32 %v2735_v3, %v1289_v39 }
 0x369   : > { %2111 = vpow2.f32 %v1733_v45  ;;  %v1735_v56 = vmul.f32 -1.442695, %v1308_v52 }
 0x36a   : > { %2113 = vpow2.f32 %v1734_v49 }
 0x372   : > { %v2110_v53 = vpop.eup %2109 }
 0x373   : > { %v1301_v54 = vadd.f32 1.0, %v2110_v53 }
 0x375   : > { %2115 = vrcp.f32 %v1301_v54 }
 0x376   : > { %v2112_v57 = vpop.eup %2111  ;;  %2117 = vpow2.f32 %v1735_v56  ;;  %v2976_v56 = vld [vmem:[#allocation14_spill] sm:$0xff] }
 0x377   : > { %v1302_v59 = vadd.f32 1.0, %v2112_v57  ;;  %v2114_v62 = vpop.eup %2113 }
 0x378   : > { %v1315_v22 = vadd.f32 1.0, %v2114_v62 }
 0x379   : > { %2119 = vrcp.f32 %v1302_v59 }
 0x382   : > { %v2116_v2 = vpop.eup %2115 }
 0x383   : > { %v1323_v58 = vmul.f32 %v2116_v2, %v1321_v1  ;;  %v2118_v8 = vpop.eup %2117 }
 0x384   : > { %v1316_v20 = vadd.f32 1.0, %v2118_v8 }
 0x385   : > { %v1325_v12 = vadd.f32 %v1323_v58, %v2970_v4  ;;  %v2977_v58 = vld [vmem:[#allocation16_spill] sm:$0xff] }
 0x386   : > { %v2120_v9 = vpop.eup %2119 }
 0x387   : > { %2121 = vtanh.f32 %v1325_v12  ;;  %v1324_v60 = vmul.f32 %v2120_v9, %v1322_v14  ;;  %v1498_v9 = vpop.permute.xlu0 %1497 }
 0x388   : > { %2123 = vrcp.f32 %v1315_v22  ;;  %vm1502_vm15 = vcmp.eq.s32.totalorder %v1498_v9, 1 }
 0x389   : > { %v1326_v63 = vadd.f32 %v1324_v60, %v2971_v23 }
 0x38b   : > { %2125 = vtanh.f32 %v1326_v63 }
 0x38c   : > { %2127 = vrcp.f32 %v1316_v20 }
 0x394   : > { %v2122_v55 = vpop.eup %2121 }
 0x395   : > { %v1329_v40 = vsub.f32 %v2802_v35, %v2122_v55  ;;  %v2124_v0 = vpop.eup %2123 }
 0x397   : > { %v1331_v16 = vmul.f32 %v2124_v0, %v1329_v40 }
 0x398   : > { %v2126_v19 = vpop.eup %2125 }
 0x399   : > { %v1330_v37 = vsub.f32 %v2805_v11, %v2126_v19  ;;  %v1333_v48 = vadd.f32 %v2122_v55, %v1331_v16  ;;  %v2128_v18 = vpop.eup %2127  ;;  %v1501_v55 = vpop.permute.xlu1 %1500 }
 0x39a   : > { %vm1503_vm0 = vcmp.eq.s32.totalorder %v1501_v55, 1 }
 0x39b   : > { %v1332_v5 = vmul.f32 %v2128_v18, %v1330_v37  ;;  %v1349_v61 = vsel %vm1347_vm13, %v1333_v48, 0.0  ;;  %v2855_v51 = vsel %vm1347_vm13, %v1333_v48, %v2802_v35  ;;  %v2973_v35 = vld [vmem:[#allocation20_spill] sm:$0xff] }
 0x39c   : > { %1736 = vst [vmem:[%s2501_s9 + $0x20] sm:$0xff] %v1349_v61 }
 0x39d   : > { %v1334_v42 = vadd.f32 %v2126_v19, %v1332_v5 }
 0x39f   : > { %v1350_v15 = vsel %vm1348_vm14, %v1334_v42, 0.0  ;;  %v2858_v6 = vsel %vm1348_vm14, %v1334_v42, %v2805_v11 }
 0x3a0   : > { %1737 = vst [vmem:[%s2501_s9 + $0x28] sm:$0xff] %v1350_v15  ;;  %v1363_v32 = vpack.c.bf16 %v2858_v6, %v2855_v51 }
 0x3a2   : > { %1397 = vmatmul.mubr.bf16.vlgmr.msra.gmra.mxu0 %v1363_v32  ;;  %1903 = vmatmul.mubr.bf16.vlgmr.msra.gmra.mxu1 %v1363_v32 }
 0x462   : > { %v1398_v7 = vpop.f32.mrf.mxu0  ;;  %v1441_v10 = vpop.f32.mrf.mxu1 }
 0x463   : > { %v1448_v17 = vadd.f32 %v1398_v7, %v2972_v13  ;;  %v1476_v49 = vadd.f32 %v2735_v3, %v1441_v10 }
 0x464   : > { %v1400_v21 = vpop.f32.mrf.mxu0  ;;  %v1904_v38 = vpop.f32.mrf.mxu1 }
 0x465   : > { %v1738_v50 = vmul.f32 -1.442695, %v1448_v17  ;;  %v1462_v30 = vadd.f32 %v1400_v21, %v2974_v28 }
 0x466   : > { %v1402_v25 = vpop.f32.mrf.mxu0  ;;  %v1444_v44 = vpop.f32.mrf.mxu1 }
 0x467   : > { %2129 = vpow2.f32 %v1738_v50  ;;  %v1449_v26 = vadd.f32 %v1402_v25, %v2973_v35  ;;  %v1740_v33 = vmul.f32 -1.442695, %v1462_v30  ;;  %v1477_v62 = vadd.f32 %v2735_v3, %v1444_v44 }
 0x468   : > { %v1905_v11 = vpop.f32.mrf.mxu1  ;;  %v1404_v31 = vpop.f32.mrf.mxu0 }
 0x469   : > { %v1739_v27 = vmul.f32 -1.442695, %v1449_v26  ;;  %v1463_v36 = vadd.f32 %v1404_v31, %v2975_v34 }
 0x46b   : > { %2131 = vpow2.f32 %v1739_v27  ;;  %v1741_v43 = vmul.f32 -1.442695, %v1463_v36 }
 0x46c   : > { %2133 = vpow2.f32 %v1740_v33 }
 0x474   : > { %v2130_v39 = vpop.eup %2129 }
 0x475   : > { %v1456_v41 = vadd.f32 1.0, %v2130_v39 }
 0x477   : > { %2135 = vrcp.f32 %v1456_v41 }
 0x478   : > { %v2132_v45 = vpop.eup %2131  ;;  %2137 = vpow2.f32 %v1741_v43 }
 0x479   : > { %v1457_v46 = vadd.f32 1.0, %v2132_v45  ;;  %v2134_v47 = vpop.eup %2133 }
 0x47a   : > { %v1470_v59 = vadd.f32 1.0, %v2134_v47 }
 0x47b   : > { %2139 = vrcp.f32 %v1457_v46 }
 0x484   : > { %v2136_v52 = vpop.eup %2135 }
 0x485   : > { %v1478_v53 = vmul.f32 %v2136_v52, %v1476_v49  ;;  %v2138_v54 = vpop.eup %2137 }
 0x486   : > { %v1471_v4 = vadd.f32 1.0, %v2138_v54 }
 0x487   : > { %v1480_v57 = vadd.f32 %v1478_v53, %v2976_v56 }
 0x488   : > { %v2140_v1 = vpop.eup %2139 }
 0x489   : > { %2141 = vtanh.f32 %v1480_v57  ;;  %v1479_v2 = vmul.f32 %v2140_v1, %v1477_v62 }
 0x48a   : > { %2143 = vrcp.f32 %v1470_v59 }
 0x48b   : > { %v1481_v8 = vadd.f32 %v1479_v2, %v2977_v58 }
 0x48d   : > { %2145 = vtanh.f32 %v1481_v8 }
 0x48e   : > { %2147 = vrcp.f32 %v1471_v4 }
 0x496   : > { %v2142_v12 = vpop.eup %2141 }
 0x497   : > { %v1484_v22 = vsub.f32 %v2855_v51, %v2142_v12  ;;  %v2144_v14 = vpop.eup %2143 }
 0x499   : > { %v1486_v60 = vmul.f32 %v2144_v14, %v1484_v22 }
 0x49a   : > { %v2146_v23 = vpop.eup %2145 }
 0x49b   : > { %v1488_v3 = vadd.f32 %v2142_v12, %v1486_v60  ;;  %v1485_v63 = vsub.f32 %v2858_v6, %v2146_v23  ;;  %v2148_v20 = vpop.eup %2147 }
 0x49d   : > { %v1504_v40 = vsel %vm1502_vm15, %v1488_v3, 0.0  ;;  %v1509_v0 = vsel %vm1502_vm15, %v1488_v3, %v2855_v51  ;;  %v1487_v16 = vmul.f32 %v2148_v20, %v1485_v63 }
 0x49e   : > { %1742 = vst [vmem:[%s2501_s9 + $0x30] sm:$0xff] %v1504_v40  ;;  %1511 = vst [vmem:[#allocation2] sm:$0xff] %v1509_v0 }
 0x49f   : > { %v1489_v19 = vadd.f32 %v2146_v23, %v1487_v16 }
 0x4a1   : > { %v1505_v29 = vsel %vm1503_vm0, %v1489_v19, 0.0  ;;  %v1510_v37 = vsel %vm1503_vm0, %v1489_v19, %v2858_v6 }
 0x4a2   : > { %1743 = vst [vmem:[%s2501_s9 + $0x38] sm:$0xff] %v1505_v29  ;;  %1512 = vst [vmem:[#allocation2 + $0x8] sm:$0xff] %v1510_v37 }
 0x4a3   : > { %2242 = shalt.err (!%p2239_p10)
}
 0x4a4   : > { %s2243_s9 = scalar_lea.hbm %s2880_s20, 1024  ;;  %s2247_s18 = scalar_lea.hbm %s2938_s6, 2048 }
 0x4a5   : > { %p2244_p1 = scmp.ne.s32.totalorder %s2880_s20, %s2243_s9  ;;  %p2248_p12 = scmp.lt.s32.totalorder %s2880_s20, %s2938_s6 }
 0x4a6   : > { %p2249_p3 = scmp.lt.s32.totalorder %s2247_s18, %s2243_s9 }
 0x4a7   : > { %p2245_p4 = pnand %p2244_p1, %p2459_p7 }
 0x4a8   : > { %p2250_p8 = por %p2249_p3, %p2248_p12 }
 0x4a9   : > { %p2246_p6 = pneg %p2245_p4 }
 0x4ab   : > { %p2251_p9 = pnand %p2250_p8, %p2246_p6 }
 0x4ad   : > { %2254 = shalt.err (!%p2251_p9)
}
 0x4ae   : > { %s2327_s27 = smov 128   ;;  %s2328_s29 = smov 8  }
 0x4af   : > { %1916 = dma.vmem_to_hbm [thread:$0]  (%p2459_p7), %s2882_s2, 1024, %s2880_s20, %s1514_s24, %s2327_s27, %s2327_s27, %s2328_s29  }
 0x4b0 PF: > { %s1545_s7 = sand.u32 1, %s2293_s21   ;;  %p2978_p11 = scmp.ne.s32.totalorder %s2951_s8, 0 }
 0x4b1   : > { %p2979_p2 = scmp.ge.s32.totalorder %s2313_s26, 2  ;;  %s1546_s28 = scalar_lea.sflag [#allocation6], %s1545_s7 }
 0x4b3   : > { %p1930_p13 = pnand %p2979_p2, %p2978_p11 }
 0x4b5   : > { %p1931_p0 = pneg %p1930_p13 }
 0x4b7   : > { %2288 = dma.done.wait (%p1931_p0), %s1546_s28, 1024  }
 0x4b8   : > { %2290 = vsyncadd (%p1931_p0), %s1546_s28, 4294966272  ;;  %s23_s26 = sadd.s32 1, %s2313_s26   ;;  %s2980_s21 = smov %s2297_s22 }
 0x4b9   : > { %p20_p5 = scmp.ge.s32.totalorder %s23_s26, 4   ;;  %s2981_s22 = smov %s2301_s23 }
 0x4ba   : > { %s2982_s23 = smov %s2468_s17  ;;  %s2983_s24 = smov %s2309_s25 }
 0x4bb   : > { %s2984_s25 = smov %s2986_s10  ;;  %22 = sbr.rel (!%p20_p5) target bundleno = 10 (0xa), region = 110 }
 0x4c0   :  { %1551 = vsyncpa [#allocation5], 1 }
 0x4c1   :  { %1553 = vsyncpa [#allocation5 + $0x1], 1 }
 0x4c2   :  { %1554 = vsyncpa [#allocation8], 1 }
 0x4c3   :  { %1555 = vsyncpa [#allocation6], 1 }
 0x4c4   :  { %1557 = vsyncpa [#allocation6 + $0x1], 1 }

</bundles_post_ra>
